<compile_context>
chip_gen: v7x
topology: tpu7x:2x2x1
jax: 0.10.0
libtpu: 0.0.40
codegen_flags: <defaults>
</compile_context>

<pallas_src>
import functools

import jax
import jax.numpy as jnp
from jax.experimental import pallas as pl
from jax.experimental.pallas import tpu as pltpu


def _bias_attention_kernel(xq_ref, xkvT_ref, bias_ref,
                           wq_ref, bq_ref, wkT_ref, bk_ref, wvT_ref, bv_ref,
                           wp_ref, bp_ref,
                           out_ref,
                           kt_s, v_s, *, num_heads, head_dim):
    f32, bf16 = jnp.float32, jnp.bfloat16
    H, Dh = num_heads, head_dim
    HD = H * Dh

    # ---- k / v projections: hoisted, computed once per batch (q-tile 0) ----
    @pl.when(pl.program_id(1) == 0)
    def _():
        xkvT = xkvT_ref[0]                                     # (Ckv, Nk) bf16
        Nk = xkvT.shape[-1]
        # Lane-dense (HD, Ckv) @ (Ckv, Nk) matmuls; f32 accumulation.
        kt = jnp.dot(wkT_ref[...], xkvT,
                     preferred_element_type=f32) + bk_ref[...]   # (HD, Nk)
        vt = jnp.dot(wvT_ref[...], xkvT,
                     preferred_element_type=f32) + bv_ref[...]   # (HD, Nk)
        # (HD, Nk) -> (H, Dh, Nk): sublane split, free (Dh multiple of 8).
        kt_s[...] = kt.reshape(H, Dh, Nk).astype(bf16)
        # v stored as (H, Nk, Dh) — one per-head minor transpose, once per batch.
        v_s[...] = jnp.transpose(vt.reshape(H, Dh, Nk), (0, 2, 1)).astype(bf16)

    xq = xq_ref[0]                                             # (TQ, Cq) bf16
    TQ = xq.shape[0]

    # ---- q projection: one lane-dense (TQ, Cq) @ (Cq, HD) matmul ----
    # (softmax scale already folded into wq / bq in the wrapper)
    q2 = jnp.dot(xq, wq_ref[...], preferred_element_type=f32) + bq_ref[...]
    qh = jnp.transpose(q2.reshape(TQ, H, Dh), (1, 0, 2)).astype(bf16)  # (H,TQ,Dh)

    # ---- attention logits + precomputed pair bias, f32 softmax stats ----
    s = jnp.einsum('hqd,hdk->hqk', qh, kt_s[...],
                   preferred_element_type=f32)                 # (H, TQ, Nk)
    s = s + bias_ref[0].astype(f32)
    s = s - jnp.max(s, axis=-1, keepdims=True)
    p = jnp.exp(s)
    p = p * pl.reciprocal(jnp.sum(p, axis=-1, keepdims=True), approx=True)

    # ---- attn @ v, then fused head-sum + output projection (K = HD) ----
    o = jnp.einsum('hqk,hkd->hqd', p.astype(bf16), v_s[...],
                   preferred_element_type=f32)                 # (H, TQ, Dh)
    o_flat = jnp.transpose(o, (1, 0, 2)).reshape(TQ, HD).astype(bf16)
    out = jnp.dot(o_flat, wp_ref[...], preferred_element_type=f32) + bp_ref[...]
    out_ref[0] = out.astype(out_ref.dtype)


def _pick_q_tile(nq, h, nk):
    # Largest candidate tile dividing Nq whose live bias+logits slab stays modest.
    for cand in (512, 256, 128, 64, 32, 16, 8):
        if nq % cand == 0 and cand <= nq:
            live = h * cand * nk * (2 * 2 + 2 * 4)   # 2x bf16 bias buf + 2x f32 slab
            if live <= (12 << 20):
                return cand
    return nq


def bias_attention(x_q, x_kv, z, params, *, num_heads, head_dim, q_tile=None):
    B, Nq, Cq = x_q.shape
    _, Nk, Ckv = x_kv.shape
    H, Dh = num_heads, head_dim
    HD = H * Dh
    scale = float(Dh) ** -0.5

    TQ = _pick_q_tile(Nq, H, Nk) if q_tile is None else min(q_tile, Nq)
    assert Nq % TQ == 0, "Nq must be divisible by the query tile"
    assert TQ == Nq or TQ % 8 == 0, "query tile must be a multiple of 8"

    bf16 = jnp.bfloat16
    f32 = jnp.float32

    # ---- wrapper-side layout / dtype plumbing (plain XLA) ----
    # softmax scale folded into the q projection.
    wq_s = (params["wq"] * scale).astype(bf16)                 # (Cq, HD)
    bq_s = (params["bq"] * scale).reshape(1, HD).astype(f32)
    # k / v weights pre-transposed for lane-dense (HD, Ckv) @ (Ckv, Nk) matmuls.
    wkT = params["wk"].T.astype(bf16)                          # (HD, Ckv)
    bk_c = params["bk"].reshape(HD, 1).astype(f32)
    wvT = params["wv"].T.astype(bf16)                          # (HD, Ckv)
    bv_c = params["bv"].reshape(HD, 1).astype(f32)
    wp = params["wproj"].astype(bf16)                          # (HD, Cq)
    bp = params["bproj"].reshape(1, Cq).astype(f32)

    # Pair bias precomputed once in XLA (reads z exactly once), stored bf16.
    bias = (jnp.einsum('bqke,he->bhqk', z, params["wb"])
            + params["bb"].reshape(1, H, 1, 1)).astype(bf16)   # (B, H, Nq, Nk)

    x_q_b = x_q.astype(bf16)                                   # (B, Nq, Cq)
    x_kvT = jnp.transpose(x_kv, (0, 2, 1)).astype(bf16)        # (B, Ckv, Nk)

    # ---- VMEM budget derived from the actual tile sizes ----
    out_itemsize = jnp.dtype(x_q.dtype).itemsize
    weights_b = 2 * (Cq * HD + 2 * HD * Ckv + HD * Cq) + 4 * (3 * HD + 2 * Cq)
    streams_b = 2 * (TQ * Cq * 2 + Ckv * Nk * 2 + H * TQ * Nk * 2
                     + TQ * Cq * out_itemsize)                 # double-buffered
    scratch_b = 2 * HD * Nk * 2                                # k,v bf16 scratch
    live_b = (2 * H * TQ * Nk + 2 * H * TQ * Dh + 2 * TQ * HD) * 4
    est = weights_b + streams_b + scratch_b + live_b + (4 << 20)
    vmem_limit = int(min(max(2 * est, 32 << 20), 64 << 20))

    kernel = functools.partial(_bias_attention_kernel, num_heads=H, head_dim=Dh)

    def _const(shape):
        n = len(shape)
        return pl.BlockSpec(shape, lambda b, qi, _n=n: (0,) * _n)

    # TODO(synk): if production Cq < 128, the (1, TQ, Cq) output block is written
    # with masked partial stores; pad Cq to 128 in the wrapper for a lane-dense
    # store path if the epilogue ever dominates.
    return pl.pallas_call(
        kernel,
        out_shape=jax.ShapeDtypeStruct((B, Nq, Cq), x_q.dtype),
        grid=(B, Nq // TQ),
        in_specs=[
            pl.BlockSpec((1, TQ, Cq), lambda b, qi: (b, qi, 0)),        # x_q tile
            pl.BlockSpec((1, Ckv, Nk), lambda b, qi: (b, 0, 0)),        # x_kv^T
            pl.BlockSpec((1, H, TQ, Nk), lambda b, qi: (b, 0, qi, 0)),  # pair bias
            _const((Cq, HD)), _const((1, HD)),     # wq (scaled), bq (scaled)
            _const((HD, Ckv)), _const((HD, 1)),    # wk^T, bk
            _const((HD, Ckv)), _const((HD, 1)),    # wv^T, bv
            _const((HD, Cq)), _const((1, Cq)),     # wproj, bproj
        ],
        out_specs=pl.BlockSpec((1, TQ, Cq), lambda b, qi: (b, qi, 0)),
        scratch_shapes=[
            pltpu.VMEM((H, Dh, Nk), bf16),         # k, pre-transposed per head
            pltpu.VMEM((H, Nk, Dh), bf16),         # v
        ],
        compiler_params=pltpu.CompilerParams(
            dimension_semantics=("parallel", "arbitrary"),
            vmem_limit_bytes=vmem_limit,
        ),
    )(x_q_b, x_kvT, bias,
      wq_s, bq_s, wkT, bk_c, wvT, bv_c, wp, bp)


def init_params(key, c_q, c_kv, head_dim, num_heads, bias_dim,
                dtype=jnp.float32):
    HD = num_heads * head_dim
    ks = jax.random.split(key, 10)
    s = 0.02

    def w(k, shape):
        return (s * jax.random.normal(k, shape)).astype(dtype)

    return {
        # q: Linear(c_q, HD), stored as (in, out) = W_pt.T
        "wq": w(ks[0], (c_q, HD)), "bq": w(ks[1], (HD,)),
        # kv: Linear(c_kv, 2*HD) split into the k / v halves of its output
        "wk": w(ks[2], (c_kv, HD)), "bk": w(ks[3], (HD,)),
        "wv": w(ks[4], (c_kv, HD)), "bv": w(ks[5], (HD,)),
        # bias: Linear(bias_dim, num_heads), kept in PyTorch (out, in) layout
        "wb": w(ks[6], (num_heads, bias_dim)), "bb": w(ks[7], (num_heads,)),
        # proj: Linear(HD, c_q)
        "wproj": w(ks[8], (HD, c_q)), "bproj": w(ks[9], (c_q,)),
    }


def bias_attention_reference(x_q, x_kv, z, params, *, num_heads, head_dim):
    B, Nq, _ = x_q.shape
    Nk = x_kv.shape[1]
    H, Dh = num_heads, head_dim
    scale = float(Dh) ** -0.5
    q = (x_q @ params["wq"] + params["bq"]).reshape(B, Nq, H, Dh).transpose(0, 2, 1, 3)
    k = (x_kv @ params["wk"] + params["bk"]).reshape(B, Nk, H, Dh).transpose(0, 2, 1, 3)
    v = (x_kv @ params["wv"] + params["bv"]).reshape(B, Nk, H, Dh).transpose(0, 2, 1, 3)
    attn = jnp.einsum("bhqd,bhkd->bhqk", q, k) * scale
    bias = (jnp.einsum("bqke,he->bhqk", z, params["wb"])
            + params["bb"].reshape(1, H, 1, 1))
    attn = jax.nn.softmax(attn + bias, axis=-1)
    o = jnp.einsum("bhqk,bhkd->bhqd", attn, v)
    o = o.transpose(0, 2, 1, 3).reshape(B, Nq, H * Dh)
    return o @ params["wproj"] + params["bproj"]


if __name__ == "__main__":
    B, Nq, Nk = 2, 16, 128
    c_q, c_kv = 64, 96
    num_heads, head_dim, bias_dim = 4, 32, 8

    key = jax.random.PRNGKey(0)
    kq, kkv, kz, kp = jax.random.split(key, 4)
    x_q = jax.random.normal(kq, (B, Nq, c_q), dtype=jnp.float32)
    x_kv = jax.random.normal(kkv, (B, Nk, c_kv), dtype=jnp.float32)
    z = jax.random.normal(kz, (B, Nq, Nk, bias_dim), dtype=jnp.float32)
    params = init_params(kp, c_q, c_kv, head_dim, num_heads, bias_dim)

    out = bias_attention(x_q, x_kv, z, params, num_heads=num_heads,
                         head_dim=head_dim, q_tile=8)
    out = jax.block_until_ready(out)
    assert out.shape == (B, Nq, c_q) and out.dtype == jnp.float32

    ref = bias_attention_reference(x_q, x_kv, z, params,
                                   num_heads=num_heads, head_dim=head_dim)
    err = float(jnp.max(jnp.abs(out - ref)))
    assert err < 2e-2, f"max abs error too large: {err}"
    print("KERNEL_OK")
</pallas_src>

<mosaic_0001>
module attributes {stable_mosaic.version = 11 : i64} {
  func.func @_bias_attention_kernel(%arg0: i32, %arg1: i32, %arg2: memref<1x8x64xbf16, #tpu.memory_space<vmem>>, %arg3: memref<1x96x128xbf16, #tpu.memory_space<vmem>>, %arg4: memref<1x4x8x128xbf16, #tpu.memory_space<vmem>>, %arg5: memref<64x128xbf16, #tpu.memory_space<vmem>>, %arg6: memref<1x128xf32, #tpu.memory_space<vmem>>, %arg7: memref<128x96xbf16, #tpu.memory_space<vmem>>, %arg8: memref<128x1xf32, #tpu.memory_space<vmem>>, %arg9: memref<128x96xbf16, #tpu.memory_space<vmem>>, %arg10: memref<128x1xf32, #tpu.memory_space<vmem>>, %arg11: memref<128x64xbf16, #tpu.memory_space<vmem>>, %arg12: memref<1x64xf32, #tpu.memory_space<vmem>>, %arg13: memref<1x8x64xf32, #tpu.memory_space<vmem>>, %arg14: memref<4x32x128xbf16, #tpu.memory_space<vmem>>, %arg15: memref<4x128x32xbf16, #tpu.memory_space<vmem>>) attributes {dimension_semantics = [#tpu.dimension_semantics<parallel>, #tpu.dimension_semantics<arbitrary>], iteration_bounds = array<i64: 2, 2>, scalar_prefetch = 0 : i64, scratch_operands = 2 : i64, tpu.core_type = #tpu.core_type<tc>, window_params = [{transform_indices = @transform_0, window_bounds = array<i64: 1, 8, 64>}, {transform_indices = @transform_1, window_bounds = array<i64: 1, 96, 128>}, {transform_indices = @transform_2, window_bounds = array<i64: 1, 4, 8, 128>}, {pipeline_mode = #tpu.pipeline_mode<synchronous>, transform_indices = @transform_3, window_bounds = array<i64: 64, 128>}, {pipeline_mode = #tpu.pipeline_mode<synchronous>, transform_indices = @transform_4, window_bounds = array<i64: 1, 128>}, {pipeline_mode = #tpu.pipeline_mode<synchronous>, transform_indices = @transform_5, window_bounds = array<i64: 128, 96>}, {pipeline_mode = #tpu.pipeline_mode<synchronous>, transform_indices = @transform_6, window_bounds = array<i64: 128, 1>}, {pipeline_mode = #tpu.pipeline_mode<synchronous>, transform_indices = @transform_7, window_bounds = array<i64: 128, 96>}, {pipeline_mode = #tpu.pipeline_mode<synchronous>, transform_indices = @transform_8, window_bounds = array<i64: 128, 1>}, {pipeline_mode = #tpu.pipeline_mode<synchronous>, transform_indices = @transform_9, window_bounds = array<i64: 128, 64>}, {pipeline_mode = #tpu.pipeline_mode<synchronous>, transform_indices = @transform_10, window_bounds = array<i64: 1, 64>}, {transform_indices = @transform_11, window_bounds = array<i64: 1, 8, 64>}]} {
    %c0_i32 = arith.constant 0 : i32
    %0 = arith.cmpi eq, %arg1, %c0_i32 : i32
    %1 = arith.extui %0 : i1 to i32
    %c0_i32_0 = arith.constant 0 : i32
    %2 = arith.cmpi ne, %1, %c0_i32_0 : i32
    scf.if %2 {
      %c0_29 = arith.constant 0 : index
      %c0_30 = arith.constant 0 : index
      %c0_31 = arith.constant 0 : index
      %43 = vector.load %arg3[%c0_29, %c0_30, %c0_31] : memref<1x96x128xbf16, #tpu.memory_space<vmem>>, vector<1x96x128xbf16>
      %44 = vector.shape_cast %43 : vector<1x96x128xbf16> to vector<96x128xbf16>
      %c0_32 = arith.constant 0 : index
      %c0_33 = arith.constant 0 : index
      %45 = vector.load %arg7[%c0_32, %c0_33] : memref<128x96xbf16, #tpu.memory_space<vmem>>, vector<128x96xbf16>
      %cst_34 = arith.constant dense<0.000000e+00> : vector<128x128xf32>
      %46 = tpu.matmul %45, %44, %cst_34 {dimension_numbers = #tpu.dot_dimension_numbers<[1], [0], [0], [1], [0, 0, 1, 1], [], []>} : vector<128x96xbf16>, vector<96x128xbf16>, vector<128x128xf32> -> vector<128x128xf32>
      %c0_35 = arith.constant 0 : index
      %c0_36 = arith.constant 0 : index
      %47 = vector.load %arg8[%c0_35, %c0_36] : memref<128x1xf32, #tpu.memory_space<vmem>>, vector<128x1xf32>
      %48 = vector.broadcast %47 : vector<128x1xf32> to vector<128x128xf32>
      %49 = arith.addf %46, %48 : vector<128x128xf32>
      %c0_37 = arith.constant 0 : index
      %c0_38 = arith.constant 0 : index
      %50 = vector.load %arg9[%c0_37, %c0_38] : memref<128x96xbf16, #tpu.memory_space<vmem>>, vector<128x96xbf16>
      %cst_39 = arith.constant dense<0.000000e+00> : vector<128x128xf32>
      %51 = tpu.matmul %50, %44, %cst_39 {dimension_numbers = #tpu.dot_dimension_numbers<[1], [0], [0], [1], [0, 0, 1, 1], [], []>} : vector<128x96xbf16>, vector<96x128xbf16>, vector<128x128xf32> -> vector<128x128xf32>
      %c0_40 = arith.constant 0 : index
      %c0_41 = arith.constant 0 : index
      %52 = vector.load %arg10[%c0_40, %c0_41] : memref<128x1xf32, #tpu.memory_space<vmem>>, vector<128x1xf32>
      %53 = vector.broadcast %52 : vector<128x1xf32> to vector<128x128xf32>
      %54 = arith.addf %51, %53 : vector<128x128xf32>
      %55 = vector.shape_cast %49 : vector<128x128xf32> to vector<4x32x128xf32>
      %56 = arith.truncf %55 : vector<4x32x128xf32> to vector<4x32x128xbf16>
      %c0_42 = arith.constant 0 : index
      %c0_43 = arith.constant 0 : index
      %c0_44 = arith.constant 0 : index
      %57 = vector.load %arg14[%c0_42, %c0_43, %c0_44] : memref<4x32x128xbf16, #tpu.memory_space<vmem>>, vector<4x32x128xbf16>
      tpu.vector_store %arg14[%c0_42, %c0_43, %c0_44], %56 {strides = array<i32>} : memref<4x32x128xbf16, #tpu.memory_space<vmem>>, vector<4x32x128xbf16>,
      %58 = vector.shape_cast %54 : vector<128x128xf32> to vector<4x32x128xf32>
      %59 = tpu.transpose %58, [0, 2, 1] : vector<4x32x128xf32> -> vector<4x128x32xf32>
      %60 = arith.truncf %59 : vector<4x128x32xf32> to vector<4x128x32xbf16>
      %c0_45 = arith.constant 0 : index
      %c0_46 = arith.constant 0 : index
      %c0_47 = arith.constant 0 : index
      %61 = vector.load %arg15[%c0_45, %c0_46, %c0_47] : memref<4x128x32xbf16, #tpu.memory_space<vmem>>, vector<4x128x32xbf16>
      tpu.vector_store %arg15[%c0_45, %c0_46, %c0_47], %60 {strides = array<i32>} : memref<4x128x32xbf16, #tpu.memory_space<vmem>>, vector<4x128x32xbf16>,
    } else {
    }
    %c0 = arith.constant 0 : index
    %c0_1 = arith.constant 0 : index
    %c0_2 = arith.constant 0 : index
    %3 = vector.load %arg2[%c0, %c0_1, %c0_2] : memref<1x8x64xbf16, #tpu.memory_space<vmem>>, vector<1x8x64xbf16>
    %4 = vector.shape_cast %3 : vector<1x8x64xbf16> to vector<8x64xbf16>
    %c0_3 = arith.constant 0 : index
    %c0_4 = arith.constant 0 : index
    %5 = vector.load %arg5[%c0_3, %c0_4] : memref<64x128xbf16, #tpu.memory_space<vmem>>, vector<64x128xbf16>
    %cst = arith.constant dense<0.000000e+00> : vector<8x128xf32>
    %6 = tpu.matmul %4, %5, %cst {dimension_numbers = #tpu.dot_dimension_numbers<[1], [0], [0], [1], [0, 0, 1, 1], [], []>} : vector<8x64xbf16>, vector<64x128xbf16>, vector<8x128xf32> -> vector<8x128xf32>
    %c0_5 = arith.constant 0 : index
    %c0_6 = arith.constant 0 : index
    %7 = vector.load %arg6[%c0_5, %c0_6] : memref<1x128xf32, #tpu.memory_space<vmem>>, vector<1x128xf32>
    %8 = vector.broadcast %7 : vector<1x128xf32> to vector<8x128xf32>
    %9 = arith.addf %6, %8 : vector<8x128xf32>
    %10 = vector.shape_cast %9 : vector<8x128xf32> to vector<8x4x32xf32>
    %11 = tpu.transpose %10, [1, 0, 2] : vector<8x4x32xf32> -> vector<4x8x32xf32>
    %12 = arith.truncf %11 : vector<4x8x32xf32> to vector<4x8x32xbf16>
    %c0_7 = arith.constant 0 : index
    %c0_8 = arith.constant 0 : index
    %c0_9 = arith.constant 0 : index
    %13 = vector.load %arg14[%c0_7, %c0_8, %c0_9] : memref<4x32x128xbf16, #tpu.memory_space<vmem>>, vector<4x32x128xbf16>
    "tpu.trace_start"() <{level = 10 : i32, message = "hqd,hdk->hqk"}> : () -> ()
    %cst_10 = arith.constant dense<0.000000e+00> : vector<4x8x128xf32>
    %14 = tpu.matmul %12, %13, %cst_10 {dimension_numbers = #tpu.dot_dimension_numbers<[2], [1], [1], [2], [0, 0, 0, 1, 1, 2], [0], [0]>} : vector<4x8x32xbf16>, vector<4x32x128xbf16>, vector<4x8x128xf32> -> vector<4x8x128xf32>
    "tpu.trace_stop"() : () -> ()
    %c0_11 = arith.constant 0 : index
    %c0_12 = arith.constant 0 : index
    %c0_13 = arith.constant 0 : index
    %c0_14 = arith.constant 0 : index
    %15 = vector.load %arg4[%c0_11, %c0_12, %c0_13, %c0_14] : memref<1x4x8x128xbf16, #tpu.memory_space<vmem>>, vector<1x4x8x128xbf16>
    %16 = vector.shape_cast %15 : vector<1x4x8x128xbf16> to vector<4x8x128xbf16>
    %17 = arith.extf %16 : vector<4x8x128xbf16> to vector<4x8x128xf32>
    %18 = arith.addf %14, %17 : vector<4x8x128xf32>
    %cst_15 = arith.constant dense<0xFF800000> : vector<4x8xf32>
    %19 = vector.multi_reduction <maximumf>, %18, %cst_15 [2] : vector<4x8x128xf32> to vector<4x8xf32>
    %20 = vector.shape_cast %19 : vector<4x8xf32> to vector<4x8x1xf32>
    %21 = vector.broadcast %20 : vector<4x8x1xf32> to vector<4x8x128xf32>
    %22 = arith.subf %18, %21 : vector<4x8x128xf32>
    %23 = math.exp %22 : vector<4x8x128xf32>
    %cst_16 = arith.constant dense<0.000000e+00> : vector<4x8xf32>
    %24 = vector.multi_reduction <add>, %23, %cst_16 [2] : vector<4x8x128xf32> to vector<4x8xf32>
    %25 = vector.shape_cast %24 : vector<4x8xf32> to vector<4x8x1xf32>
    %26 = tpu.reciprocal %25 {approx = true} : vector<4x8x1xf32> -> vector<4x8x1xf32>
    %27 = vector.broadcast %26 : vector<4x8x1xf32> to vector<4x8x128xf32>
    %28 = arith.mulf %23, %27 : vector<4x8x128xf32>
    %29 = arith.truncf %28 : vector<4x8x128xf32> to vector<4x8x128xbf16>
    %c0_17 = arith.constant 0 : index
    %c0_18 = arith.constant 0 : index
    %c0_19 = arith.constant 0 : index
    %30 = vector.load %arg15[%c0_17, %c0_18, %c0_19] : memref<4x128x32xbf16, #tpu.memory_space<vmem>>, vector<4x128x32xbf16>
    "tpu.trace_start"() <{level = 10 : i32, message = "hqk,hkd->hqd"}> : () -> ()
    %cst_20 = arith.constant dense<0.000000e+00> : vector<4x8x32xf32>
    %31 = tpu.matmul %29, %30, %cst_20 {dimension_numbers = #tpu.dot_dimension_numbers<[2], [1], [1], [2], [0, 0, 0, 1, 1, 2], [0], [0]>} : vector<4x8x128xbf16>, vector<4x128x32xbf16>, vector<4x8x32xf32> -> vector<4x8x32xf32>
    "tpu.trace_stop"() : () -> ()
    %32 = tpu.transpose %31, [1, 0, 2] : vector<4x8x32xf32> -> vector<8x4x32xf32>
    %33 = vector.shape_cast %32 : vector<8x4x32xf32> to vector<8x128xf32>
    %34 = arith.truncf %33 : vector<8x128xf32> to vector<8x128xbf16>
    %c0_21 = arith.constant 0 : index
    %c0_22 = arith.constant 0 : index
    %35 = vector.load %arg11[%c0_21, %c0_22] : memref<128x64xbf16, #tpu.memory_space<vmem>>, vector<128x64xbf16>
    %cst_23 = arith.constant dense<0.000000e+00> : vector<8x64xf32>
    %36 = tpu.matmul %34, %35, %cst_23 {dimension_numbers = #tpu.dot_dimension_numbers<[1], [0], [0], [1], [0, 0, 1, 1], [], []>} : vector<8x128xbf16>, vector<128x64xbf16>, vector<8x64xf32> -> vector<8x64xf32>
    %c0_24 = arith.constant 0 : index
    %c0_25 = arith.constant 0 : index
    %37 = vector.load %arg12[%c0_24, %c0_25] : memref<1x64xf32, #tpu.memory_space<vmem>>, vector<1x64xf32>
    %38 = vector.broadcast %37 : vector<1x64xf32> to vector<8x64xf32>
    %39 = arith.addf %36, %38 : vector<8x64xf32>
    %c0_26 = arith.constant 0 : index
    %c0_27 = arith.constant 0 : index
    %c0_28 = arith.constant 0 : index
    %40 = vector.load %arg13[%c0_26, %c0_27, %c0_28] : memref<1x8x64xf32, #tpu.memory_space<vmem>>, vector<1x8x64xf32>
    %41 = vector.shape_cast %40 : vector<1x8x64xf32> to vector<8x64xf32>
    %42 = vector.shape_cast %39 : vector<8x64xf32> to vector<1x8x64xf32>
    tpu.vector_store %arg13[%c0_26, %c0_27, %c0_28], %42 {strides = array<i32>} : memref<1x8x64xf32, #tpu.memory_space<vmem>>, vector<1x8x64xf32>,
    return
  }
  func.func @transform_0(%arg0: i32, %arg1: i32) -> (i32, i32, i32) {
    %c0_i32 = arith.constant 0 : i32
    %c0_i32_0 = arith.constant 0 : i32
    return %arg0, %arg1, %c0_i32 : i32, i32, i32
  }
  func.func @transform_1(%arg0: i32, %arg1: i32) -> (i32, i32, i32) {
    %c0_i32 = arith.constant 0 : i32
    %c0_i32_0 = arith.constant 0 : i32
    %c0_i32_1 = arith.constant 0 : i32
    return %arg0, %c0_i32, %c0_i32_0 : i32, i32, i32
  }
  func.func @transform_2(%arg0: i32, %arg1: i32) -> (i32, i32, i32, i32) {
    %c0_i32 = arith.constant 0 : i32
    %c0_i32_0 = arith.constant 0 : i32
    %c0_i32_1 = arith.constant 0 : i32
    return %arg0, %c0_i32, %arg1, %c0_i32_0 : i32, i32, i32, i32
  }
  func.func @transform_3(%arg0: i32, %arg1: i32) -> (i32, i32) {
    %c0_i32 = arith.constant 0 : i32
    %c0_i32_0 = arith.constant 0 : i32
    %c0_i32_1 = arith.constant 0 : i32
    return %c0_i32, %c0_i32_0 : i32, i32
  }
  func.func @transform_4(%arg0: i32, %arg1: i32) -> (i32, i32) {
    %c0_i32 = arith.constant 0 : i32
    %c0_i32_0 = arith.constant 0 : i32
    %c0_i32_1 = arith.constant 0 : i32
    return %c0_i32, %c0_i32_0 : i32, i32
  }
  func.func @transform_5(%arg0: i32, %arg1: i32) -> (i32, i32) {
    %c0_i32 = arith.constant 0 : i32
    %c0_i32_0 = arith.constant 0 : i32
    %c0_i32_1 = arith.constant 0 : i32
    return %c0_i32, %c0_i32_0 : i32, i32
  }
  func.func @transform_6(%arg0: i32, %arg1: i32) -> (i32, i32) {
    %c0_i32 = arith.constant 0 : i32
    %c0_i32_0 = arith.constant 0 : i32
    %c0_i32_1 = arith.constant 0 : i32
    return %c0_i32, %c0_i32_0 : i32, i32
  }
  func.func @transform_7(%arg0: i32, %arg1: i32) -> (i32, i32) {
    %c0_i32 = arith.constant 0 : i32
    %c0_i32_0 = arith.constant 0 : i32
    %c0_i32_1 = arith.constant 0 : i32
    return %c0_i32, %c0_i32_0 : i32, i32
  }
  func.func @transform_8(%arg0: i32, %arg1: i32) -> (i32, i32) {
    %c0_i32 = arith.constant 0 : i32
    %c0_i32_0 = arith.constant 0 : i32
    %c0_i32_1 = arith.constant 0 : i32
    return %c0_i32, %c0_i32_0 : i32, i32
  }
  func.func @transform_9(%arg0: i32, %arg1: i32) -> (i32, i32) {
    %c0_i32 = arith.constant 0 : i32
    %c0_i32_0 = arith.constant 0 : i32
    %c0_i32_1 = arith.constant 0 : i32
    return %c0_i32, %c0_i32_0 : i32, i32
  }
  func.func @transform_10(%arg0: i32, %arg1: i32) -> (i32, i32) {
    %c0_i32 = arith.constant 0 : i32
    %c0_i32_0 = arith.constant 0 : i32
    %c0_i32_1 = arith.constant 0 : i32
    return %c0_i32, %c0_i32_0 : i32, i32
  }
  func.func @transform_11(%arg0: i32, %arg1: i32) -> (i32, i32, i32) {
    %c0_i32 = arith.constant 0 : i32
    %c0_i32_0 = arith.constant 0 : i32
    return %arg0, %arg1, %c0_i32 : i32, i32, i32
  }
}

</mosaic_0001>

<bundles_post_ra>
// kernel: tpu_custom_call.1
= control target key start
LH: loop header
LB: loop body
LE: loop exit
PB: predicated region body
PF: predicated region fallthrough
CT: control target
= control target key end

     0   :  { %s3794_s0 = inlined_call_operand.vmem [shape: bf16[2,16,64], index: 0, kind: input, shape index: {}]   ;;  %s3795_s1 = inlined_call_operand.vmem [shape: bf16[2,96,128], index: 1, kind: input, shape index: {}]   ;;  %s3796_s2 = inlined_call_operand.vmem [shape: bf16[2,4,16,128], index: 2, kind: input, shape index: {}]   ;;  %s3797_s3 = inlined_call_operand.vmem [shape: bf16[64,128], index: 3, kind: input, shape index: {}]   ;;  %s3798_s4 = inlined_call_operand.vmem [shape: f32[1,128], index: 4, kind: input, shape index: {}]   ;;  %s3799_s5 = inlined_call_operand.vmem [shape: bf16[128,96], index: 5, kind: input, shape index: {}]   ;;  %s3800_s6 = inlined_call_operand.vmem [shape: f32[128,1], index: 6, kind: input, shape index: {}]   ;;  %s3801_s7 = inlined_call_operand.vmem [shape: bf16[128,96], index: 7, kind: input, shape index: {}]   ;;  %s3802_s8 = inlined_call_operand.vmem [shape: f32[128,1], index: 8, kind: input, shape index: {}]   ;;  %s3803_s9 = inlined_call_operand.vmem [shape: bf16[128,64], index: 9, kind: input, shape index: {}]   ;;  %s3804_s10 = inlined_call_operand.vmem [shape: f32[1,64], index: 10, kind: input, shape index: {}]   ;;  %s3805_s11 = inlined_call_operand.hbm [shape: f32[2,16,64], index: 11, kind: output, shape index: {}]  }
   0x1   :  { %3815 = sst [smem:[#allocation17_spill]] %s3796_s2 }
   0x2   :  { %3816 = sst [smem:[#allocation18_spill]] %s3805_s11 }
   0x3   :  { %16 = vsyncpa [#allocation6], 0 }
   0x4   :  { %18 = vsyncpa [#allocation6 + $0x1], 0  ;;  %s3215_s17 = smov 0   ;;  %s3217_s18 = smov 0  }
   0x5   :  { %s3219_s19 = smov 0   ;;  %s3221_s20 = smov 0  }
   0x6   :  { %s3223_s21 = smov 0   ;;  %s3225_s22 = smov 0  }
   0x7   :  { %s3227_s23 = smov 0   ;;  %s3229_s24 = smov 0  }
   0x8 LB: > { %3817 = sst [smem:[#allocation8_spill]] %s3116_s17  ;;  %s2362_s25 = sadd.s32 4294967295, %s3144_s24   ;;  %s3144_s24 = sphi %s3229_s24, %s24_s24   ;;  %s3140_s23 = sphi %s3227_s23, %s3839_s23   ;;  %s3136_s22 = sphi %s3225_s22, %s3838_s22   ;;  %s3132_s21 = sphi %s3223_s21, %s3837_s21   ;;  %s3128_s20 = sphi %s3221_s20, %s3836_s20   ;;  %s3124_s19 = sphi %s3219_s19, %s3835_s19   ;;  %s3120_s18 = sphi %s3217_s18, %s3834_s18   ;;  %s3116_s17 = sphi %s3215_s17, %s3833_s17  }
   0x9   : > { %3818 = sst [smem:[#allocation9_spill]] %s3120_s18  ;;  %s2363_s26 = sadd.s32 4294967294, %s3144_s24  }
   0xa   : > { %3819 = sst [smem:[#allocation10_spill]] %s3124_s19  ;;  %s33_s27 = sadd.s32 1, %s3136_s22 }
   0xb   : > { %3820 = sst [smem:[#allocation11_spill]] %s3136_s22  ;;  %p34_p0 = scmp.ge.s32.totalorder %s33_s27, 2 }
   0xc   : > { %3821 = sst [smem:[#allocation12_spill]] %s3140_s23  ;;  %s36_s28 = sadd.s32 1, %s3140_s23 }
   0xd   : > { %p106_p1 = scmp.ne.s32.totalorder %s3124_s19, %s3120_s18  ;;  %p107_p2 = scmp.eq.s32.totalorder %s3144_s24, 0 }
   0xe   : > { %s3841_s27 = smov (%p34_p0, %s33_s27), 0  ;;  %s3843_s28 = smov (!%p34_p0, %s36_s28), %s3140_s23 }
   0xf   : > { %3822 = sst [smem:[#allocation13_spill]] %s3841_s27  ;;  %s95_s29 = ssub.s32 %s3136_s22, %s3841_s27 }
  0x10   : > { %p3267_p3 = por %p107_p2, %p106_p1  ;;  %p38_p4 = scmp.ge.s32.totalorder %s3843_s28, 2 }
  0x11   : > { %p306_p5 = scmp.eq.s32.totalorder %s2362_s25, 3  ;;  %p311_p6 = scmp.ne.s32.totalorder %s3120_s18, %s3116_s17 }
  0x12   : > { %p312_p7 = scmp.eq.s32.totalorder %s2363_s26, 3  ;;  %s3845_s28 = smov (%p38_p4, %s3843_s28), 0 }
  0x13   : > { %3824 = sst [smem:[#allocation14_spill]] %s3845_s28  ;;  %p3275_p8 = por %p306_p5, %p106_p1 }
  0x14   : > { %p3279_p9 = por %p312_p7, %p311_p6  ;;  %s94_s14 = ssub.s32 %s3140_s23, %s3845_s28 }
  0x15   : > { %s96_s15 = sor.u32 %s95_s29, %s94_s14  ;;  %s99_s16 = sadd.s32 1, %s3124_s19 }
  0x16   : > { %s3826_s13 = scalar_select %p3279_p9, 1, 0 }
  0x17   : > { %p97_p10 = scmp.eq.s32.totalorder %s96_s15, 0  ;;  %p2365_p11 = scmp.ge.s32.totalorder %s3144_s24, 4 }
  0x18   : > { %3827 = sst [smem:[#allocation15_spill]] %s3826_s13 }
  0x19   : > { %s3287_s27 = scalar_select %p97_p10, %s3124_s19, %s99_s16  }
  0x1a   : > { %352 = sbr.rel (%p2365_p11) target bundleno = 45 (0x2d), region = 48 }
  0x1b   : > { %3828 = sst [smem:[#allocation16_spill]] %s3287_s27 }
  0x21   : > { %374 = sbr.rel (!%p3267_p3) target bundleno = 45 (0x2d), region = 60  ;;  %s376_s25 = sand.u32 (%p3267_p3), 1, %s3124_s19  }
  0x22   : > { %s2367_s26 = sshll.u32 (%p3267_p3), %s3140_s23, 3  ;;  %s2366_s17 = sshll.u32 (%p3267_p3), %s376_s25, 4 }
  0x23   : > { %s380_s11 = sadd.s32 (%p3267_p3), %s3136_s22, %s2367_s26  ;;  %s3829_s2 = sld [smem:[#allocation17_spill]] (%p3267_p3) }
  0x24   : > { %s2368_s13 = sshll.u32 (%p3267_p3), %s380_s11, 2  ;;  %s378_s15 = scalar_lea.vmem (%p3267_p3), [#allocation4], %s2366_s17 }
  0x29   : > { %s382_s14 = scalar_lea.vmem %s3829_s2, %s2368_s13 }
  0x2a   : > { %v398_v0 = vld [vmem:[%s382_s14] sm:$0xf]  ;;  %v400_v1 = vld [vmem:[%s382_s14 + $0x8] sm:$0xf]  ;;  %v402_v2 = vld [vmem:[%s382_s14 + $0x10] sm:$0xf] }
  0x2b   : > { %399 = vst [vmem:[%s378_s15] sm:$0xf] %v398_v0  ;;  %401 = vst [vmem:[%s378_s15 + $0x4] sm:$0xf] %v400_v1  ;;  %v404_v3 = vld [vmem:[%s382_s14 + $0x18] sm:$0xf] }
  0x2c   : > { %403 = vst [vmem:[%s378_s15 + $0x8] sm:$0xf] %v402_v2  ;;  %405 = vst [vmem:[%s378_s15 + $0xc] sm:$0xf] %v404_v3 }
  0x2d PF: > { %p2369_p12 = scmp.ge.s32.totalorder %s3144_s24, 1  ;;  %p435_p13 = scmp.lt.s32.totalorder %s3144_s24, 5 }
  0x2f   : > { %p436_p0 = pnand %p2369_p12, %p435_p13 }
  0x30   : > { %s3301_s11 = sand.u32 (!%p436_p0), 1, %s3120_s18   ;;  %p494_p1 = scmp.lt.s32.totalorder (!%p436_p0), %s3132_s21, 1 }
  0x31   : > { %439 = sbr.rel (%p436_p0) target bundleno = 2039 (0x7f7), region = 101  ;;  %s2370_s17 = sshll.u32 (!%p436_p0), %s3301_s11, 4 }
  0x32   : > { %s2371_s28 = sshll.u32 (!%p436_p0), %s3301_s11, 3  ;;  %p496_p2 = scmp.lt.s32.totalorder (!%p436_p0), %s3128_s20, 1 }
  0x33   : > { %s3319_s19 = scalar_lea.vmem (!%p436_p0), [#allocation4], %s2370_s17  ;;  %s3321_s18 = scalar_lea.vmem (!%p436_p0), [#allocation5], %s2371_s28 }
  0x34   : > { %p2375_p3 = scmp.ne.s32.totalorder (!%p436_p0), %s3128_s20, 0 }
  0x38   : > { %s495_s30 = scalar_select %p494_p1, %s3132_s21, 1 }
  0x39   : > { %s497_s25 = scalar_select %p496_p2, %s3128_s20, 1 }
  0x3a   : > { %s2372_s13 = sshll.u32 %s495_s30, 1  ;;  %s2741_s16 = smul.u32 48, %s495_s30  ;;  %v3146_v6 = vmov (!%p2375_p3), 0   ;;  %v540_v9 = vld [vmem:[%s3800_s6] sm:$0xff] (!%p2375_p3)  ;;  %vm712_vm0 = vcmask (!%p2375_p3), 785408   ;;  %v542_v12 = vld [vmem:[%s3800_s6 + $0x10] sm:$0xff] (!%p2375_p3) }
  0x3b   : > { %s499_s15 = sadd.s32 %s2372_s13, %s497_s25  ;;  %511 = sbr.rel (%p2375_p3) target bundleno = 521 (0x209), region = 109  ;;  %2822 = vset.pattern.permute.xlu0 (!%p2375_p3), %v3146_v6  ;;  %2823 = vset.pattern.permute.xlu1 (!%p2375_p3), %v3146_v6  ;;  %v3006_v10 = vld [vmem:[%s3799_s5] sm:$0xff] (!%p2375_p3)   ;;  %v541_v13 = vld [vmem:[%s3800_s6 + $0x8] sm:$0xff] (!%p2375_p3)  ;;  %v543_v15 = vld [vmem:[%s3800_s6 + $0x18] sm:$0xff] (!%p2375_p3)  ;;  %vm1283_vm1 = vcmask (!%p2375_p3), 261120  }
  0x3c   : > { %s3312_s14 = scalar_lea.vmem %s3795_s1, %s2741_s16  ;;  %s2373_s2 = sshll.u32 %s499_s15, 2  ;;  %v3007_v11 = vld [vmem:[%s3801_s7] sm:$0xff] (!%p2375_p3)   ;;  %558 = vperm.xlu0 (!%p2375_p3), %2822, %v540_v9   ;;  %2553 = vmatprep.mubr.msk.bf16.mxu0 (!%p2375_p3), %vm712_vm0, %v3006_v10  ;;  %v545_v18 = vld [vmem:[%s3800_s6 + $0x28] sm:$0xff] (!%p2375_p3)  ;;  %v546_v19 = vld [vmem:[%s3800_s6 + $0x30] sm:$0xff] (!%p2375_p3) }
  0x3d   : > { %s3317_s27 = scalar_lea.vmem %s3794_s0, %s2373_s2  ;;  %v3000_v4 = vld [vmem:[%s3312_s14] sm:$0xff] (!%p2375_p3)   ;;  %v3001_v5 = vld [vmem:[%s3312_s14 + $0x8] sm:$0xff] (!%p2375_p3)   ;;  %v3002_v7 = vld [vmem:[%s3312_s14 + $0x10] sm:$0xff] (!%p2375_p3)   ;;  %2581 = vmatprep.mubr.msk.bf16.mxu1 (!%p2375_p3), %vm712_vm0, %v3007_v11  ;;  %568 = vperm.xlu1 (!%p2375_p3), %2823, %v542_v12  }
  0x3e   : > { %2541 = vmatprep.subr.bf16.mxu0 (!%p2375_p3), %v3000_v4  ;;  %2569 = vmatprep.subr.bf16.mxu1 (!%p2375_p3), %v3000_v4  ;;  %v3003_v8 = vld [vmem:[%s3312_s14 + $0x18] sm:$0xff] (!%p2375_p3)   ;;  %v3004_v14 = vld [vmem:[%s3312_s14 + $0x20] sm:$0xff] (!%p2375_p3)   ;;  %v3005_v17 = vld [vmem:[%s3312_s14 + $0x28] sm:$0xff] (!%p2375_p3)  }
  0x3f   : > { %2542 = vmatpush3.bf16.msra.mxu0 (!%p2375_p3), %v3000_v4  ;;  %2570 = vmatpush3.bf16.msra.mxu1 (!%p2375_p3), %v3000_v4  ;;  %v544_v16 = vld [vmem:[%s3800_s6 + $0x20] sm:$0xff] (!%p2375_p3)  ;;  %v3008_v20 = vld [vmem:[%s3799_s5 + $0x8] sm:$0xff] (!%p2375_p3)   ;;  %v3010_v22 = vld [vmem:[%s3799_s5 + $0x10] sm:$0xff] (!%p2375_p3)  }
  0x40   : > { %2543 = vmatprep.subr.bf16.mxu0 (!%p2375_p3), %v3001_v5  ;;  %2571 = vmatprep.subr.bf16.mxu1 (!%p2375_p3), %v3001_v5  ;;  %v3009_v21 = vld [vmem:[%s3801_s7 + $0x8] sm:$0xff] (!%p2375_p3)   ;;  %v547_v23 = vld [vmem:[%s3800_s6 + $0x38] sm:$0xff] (!%p2375_p3)  ;;  %v548_v24 = vld [vmem:[%s3800_s6 + $0x40] sm:$0xff] (!%p2375_p3) }
  0x41   : > { %563 = vperm.xlu0 (!%p2375_p3), %2822, %v541_v13   ;;  %573 = vperm.xlu1 (!%p2375_p3), %2823, %v543_v15   ;;  %v3011_v25 = vld [vmem:[%s3801_s7 + $0x10] sm:$0xff] (!%p2375_p3)   ;;  %v549_v26 = vld [vmem:[%s3800_s6 + $0x48] sm:$0xff] (!%p2375_p3)  ;;  %v3012_v28 = vld [vmem:[%s3799_s5 + $0x18] sm:$0xff] (!%p2375_p3)  }
  0x42   : > { %v550_v27 = vld [vmem:[%s3800_s6 + $0x50] sm:$0xff]  ;;  %v3013_v29 = vld [vmem:[%s3801_s7 + $0x18] sm:$0xff]   ;;  %v552_v31 = vld [vmem:[%s3800_s6 + $0x60] sm:$0xff] }
  0x43   : > { %2544 = vmatpush3.bf16.msra.mxu0 %v3001_v5  ;;  %2572 = vmatpush3.bf16.msra.mxu1 %v3001_v5  ;;  %v551_v30 = vld [vmem:[%s3800_s6 + $0x58] sm:$0xff]  ;;  %v3014_v32 = vld [vmem:[%s3799_s5 + $0x20] sm:$0xff]   ;;  %v553_v34 = vld [vmem:[%s3800_s6 + $0x68] sm:$0xff] }
  0x44   : > { %2545 = vmatprep.subr.bf16.mxu0 %v3002_v7  ;;  %2573 = vmatprep.subr.bf16.mxu1 %v3002_v7  ;;  %v3015_v33 = vld [vmem:[%s3801_s7 + $0x20] sm:$0xff]   ;;  %v554_v35 = vld [vmem:[%s3800_s6 + $0x70] sm:$0xff]  ;;  %v3016_v36 = vld [vmem:[%s3799_s5 + $0x28] sm:$0xff]  }
  0x45   : > { %578 = vperm.xlu0 %2822, %v544_v16   ;;  %583 = vperm.xlu1 %2823, %v545_v18   ;;  %v3017_v37 = vld [vmem:[%s3801_s7 + $0x28] sm:$0xff]   ;;  %v555_v38 = vld [vmem:[%s3800_s6 + $0x78] sm:$0xff]  ;;  %v850_v39 = vld [vmem:[%s3802_s8] sm:$0xff] }
  0x46   : > { %v3018_v40 = vld [vmem:[%s3799_s5 + $0x30] sm:$0xff]   ;;  %v851_v42 = vld [vmem:[%s3802_s8 + $0x8] sm:$0xff]  ;;  %v3020_v44 = vld [vmem:[%s3799_s5 + $0x38] sm:$0xff]  }
  0x47   : > { %2546 = vmatpush3.bf16.msra.mxu0 %v3002_v7  ;;  %2574 = vmatpush3.bf16.msra.mxu1 %v3002_v7  ;;  %v3019_v41 = vld [vmem:[%s3801_s7 + $0x30] sm:$0xff]   ;;  %v3021_v45 = vld [vmem:[%s3801_s7 + $0x38] sm:$0xff]   ;;  %v854_v47 = vld [vmem:[%s3802_s8 + $0x20] sm:$0xff] }
  0x48   : > { %2547 = vmatprep.subr.bf16.mxu0 %v3003_v8  ;;  %2575 = vmatprep.subr.bf16.mxu1 %v3003_v8  ;;  %v852_v43 = vld [vmem:[%s3802_s8 + $0x10] sm:$0xff]  ;;  %v853_v46 = vld [vmem:[%s3802_s8 + $0x18] sm:$0xff]  ;;  %v855_v48 = vld [vmem:[%s3802_s8 + $0x28] sm:$0xff] }
  0x49   : > { %588 = vperm.xlu0 %2822, %v546_v19   ;;  %593 = vperm.xlu1 %2823, %v547_v23   ;;  %v856_v49 = vld [vmem:[%s3802_s8 + $0x30] sm:$0xff]  ;;  %v857_v50 = vld [vmem:[%s3802_s8 + $0x38] sm:$0xff]  ;;  %v858_v51 = vld [vmem:[%s3802_s8 + $0x40] sm:$0xff] }
  0x4a   : > { %v859_v52 = vld [vmem:[%s3802_s8 + $0x48] sm:$0xff]  ;;  %v862_v53 = vld [vmem:[%s3802_s8 + $0x60] sm:$0xff]  ;;  %v860_v55 = vld [vmem:[%s3802_s8 + $0x50] sm:$0xff] }
  0x4b   : > { %2548 = vmatpush3.bf16.msra.mxu0 %v3003_v8  ;;  %2576 = vmatpush3.bf16.msra.mxu1 %v3003_v8  ;;  %v863_v54 = vld [vmem:[%s3802_s8 + $0x68] sm:$0xff]  ;;  %v864_v56 = vld [vmem:[%s3802_s8 + $0x70] sm:$0xff]  ;;  %v861_v57 = vld [vmem:[%s3802_s8 + $0x58] sm:$0xff] }
  0x4c   : > { %2549 = vmatprep.subr.bf16.mxu0 %v3004_v14  ;;  %2577 = vmatprep.subr.bf16.mxu1 %v3004_v14  ;;  %v865_v58 = vld [vmem:[%s3802_s8 + $0x78] sm:$0xff] }
  0x4d   : > { %598 = vperm.xlu0 %2822, %v548_v24   ;;  %603 = vperm.xlu1 %2823, %v549_v26  }
  0x4f   : > { %2550 = vmatpush3.bf16.msra.mxu0 %v3004_v14  ;;  %2578 = vmatpush3.bf16.msra.mxu1 %v3004_v14 }
  0x50   : > { %2551 = vmatprep.subr.bf16.mxu0 %v3005_v17  ;;  %2579 = vmatprep.subr.bf16.mxu1 %v3005_v17 }
  0x51   : > { %608 = vperm.xlu0 %2822, %v550_v27   ;;  %613 = vperm.xlu1 %2823, %v551_v30  }
  0x53   : > { %2552 = vmatpush3.bf16.msra.mxu0 %v3005_v17  ;;  %2580 = vmatpush3.bf16.msra.mxu1 %v3005_v17 }
  0x55   : > { %618 = vperm.xlu0 %2822, %v552_v31   ;;  %623 = vperm.xlu1 %2823, %v553_v34  }
  0x56   : > { %2554 = vmatmul.mubr.msk.bf16.vlgmr.msra.gmra.mrb[0].mxu0 %vm712_vm0, %v3008_v20  ;;  %2582 = vmatmul.mubr.msk.bf16.vlgmr.msra.gmra.mrb[0].mxu1 %vm712_vm0, %v3009_v21 }
  0x57   : > { %2557 = vmatprep.mubr.msk.bf16.mxu0 %vm712_vm0, %v3010_v22  ;;  %2585 = vmatprep.mubr.msk.bf16.mxu1 %vm712_vm0, %v3011_v25 }
  0x59   : > { %628 = vperm.xlu0 %2822, %v554_v35   ;;  %633 = vperm.xlu1 %2823, %v555_v38  }
  0x5d   : > { %868 = vperm.xlu0 %2822, %v850_v39   ;;  %873 = vperm.xlu1 %2823, %v851_v42  }
  0x5e   : > { %2558 = vmatmul.mubr.msk.bf16.gmra.mrb[4].mxu0 %vm712_vm0, %v3012_v28  ;;  %2586 = vmatmul.mubr.msk.bf16.gmra.mrb[4].mxu1 %vm712_vm0, %v3013_v29 }
  0x5f   : > { %2561 = vmatprep.mubr.msk.bf16.mxu0 %vm712_vm0, %v3014_v32  ;;  %2589 = vmatprep.mubr.msk.bf16.mxu1 %vm712_vm0, %v3015_v33 }
  0x61   : > { %878 = vperm.xlu0 %2822, %v852_v43   ;;  %883 = vperm.xlu1 %2823, %v853_v46  }
  0x65   : > { %888 = vperm.xlu0 %2822, %v854_v47   ;;  %893 = vperm.xlu1 %2823, %v855_v48  }
  0x66   : > { %2562 = vmatmul.mubr.msk.bf16.gmra.mrb[8].mxu0 %vm712_vm0, %v3016_v36  ;;  %2590 = vmatmul.mubr.msk.bf16.gmra.mrb[8].mxu1 %vm712_vm0, %v3017_v37 }
  0x67   : > { %2565 = vmatprep.mubr.msk.bf16.mxu0 %vm712_vm0, %v3018_v40  ;;  %2593 = vmatprep.mubr.msk.bf16.mxu1 %vm712_vm0, %v3019_v41 }
  0x69   : > { %898 = vperm.xlu0 %2822, %v856_v49   ;;  %903 = vperm.xlu1 %2823, %v857_v50  }
  0x6d   : > { %908 = vperm.xlu0 %2822, %v858_v51   ;;  %913 = vperm.xlu1 %2823, %v859_v52  }
  0x6e   : > { %2566 = vmatmul.mubr.msk.bf16.gmra.mrb[12].mxu0 %vm712_vm0, %v3020_v44  ;;  %2594 = vmatmul.mubr.msk.bf16.gmra.mrb[12].mxu1 %vm712_vm0, %v3021_v45 }
  0x71   : > { %928 = vperm.xlu0 %2822, %v862_v53   ;;  %933 = vperm.xlu1 %2823, %v863_v54  }
  0x75   : > { %918 = vperm.xlu0 %2822, %v860_v55   ;;  %938 = vperm.xlu1 %2823, %v864_v56  }
  0x79   : > { %923 = vperm.xlu0 %2822, %v861_v57   ;;  %943 = vperm.xlu1 %2823, %v865_v58  }
  0xbb   : > { %v559_v59 = vpop.permute.xlu0 %558 }
  0xbc   : > { %v569_v60 = vpop.permute.xlu1 %568 }
  0xc0   : > { %v564_v61 = vpop.permute.xlu0 %563  ;;  %v574_v62 = vpop.permute.xlu1 %573 }
  0xc4   : > { %v579_v63 = vpop.permute.xlu0 %578  ;;  %v584_v0 = vpop.permute.xlu1 %583 }
  0xc8   : > { %v589_v1 = vpop.permute.xlu0 %588  ;;  %v594_v2 = vpop.permute.xlu1 %593 }
  0xcc   : > { %v3490_v3 = vpop.permute.xlu0 %598  ;;  %v3492_v4 = vpop.permute.xlu1 %603 }
  0xd0   : > { %v3494_v5 = vpop.permute.xlu0 %608  ;;  %v3496_v6 = vpop.permute.xlu1 %613 }
  0xd4   : > { %v3498_v7 = vpop.permute.xlu0 %618  ;;  %v3500_v8 = vpop.permute.xlu1 %623 }
  0xd8   : > { %v3502_v9 = vpop.permute.xlu0 %628  ;;  %v3504_v10 = vpop.permute.xlu1 %633 }
  0xdc   : > { %v869_v11 = vpop.permute.xlu0 %868  ;;  %v874_v12 = vpop.permute.xlu1 %873 }
  0xe0   : > { %v879_v13 = vpop.permute.xlu0 %878  ;;  %v884_v14 = vpop.permute.xlu1 %883 }
  0xe4   : > { %v889_v15 = vpop.permute.xlu0 %888  ;;  %v894_v16 = vpop.permute.xlu1 %893 }
  0xe8   : > { %v899_v17 = vpop.permute.xlu0 %898  ;;  %v904_v18 = vpop.permute.xlu1 %903 }
  0xec   : > { %v3506_v19 = vpop.permute.xlu0 %908  ;;  %v3508_v20 = vpop.permute.xlu1 %913 }
  0xf0   : > { %v3510_v35 = vpop.permute.xlu0 %928  ;;  %v3512_v36 = vpop.permute.xlu1 %933 }
 0x129   : > { %v2555_v21 = vpop.f32.mrb[0].mxu0  ;;  %v2583_v22 = vpop.f32.mrb[0].mxu1 }
 0x12a   : > { %v771_v23 = vpop.f32.mrb[1].mxu0  ;;  %v1044_v24 = vpop.f32.mrb[1].mxu1  ;;  %v780_v27 = vadd.f32 %v2555_v21, %v569_v60  ;;  %v1053_v39 = vadd.f32 %v2583_v22, %v879_v13 }
 0x12b   : > { %v2556_v25 = vpop.f32.mrb[2].mxu0  ;;  %v2584_v26 = vpop.f32.mrb[2].mxu1  ;;  %v772_v31 = vadd.f32 %v771_v23, %v559_v59  ;;  %v1045_v43 = vadd.f32 %v1044_v24, %v869_v11 }
 0x12c   : > { %v783_v28 = vadd.f32 %v2556_v25, %v574_v62  ;;  %v774_v29 = vpop.f32.mrb[3].mxu0  ;;  %v1047_v30 = vpop.f32.mrb[3].mxu1  ;;  %v1056_v44 = vadd.f32 %v2584_v26, %v884_v14 }
 0x12d   : > { %v775_v32 = vadd.f32 %v774_v29, %v564_v61  ;;  %v1048_v45 = vadd.f32 %v1047_v30, %v874_v12  ;;  %v919_v11 = vpop.permute.xlu0 %918  ;;  %v939_v12 = vpop.permute.xlu1 %938 }
 0x12e   : > { %v1108_v33 = vpack.c.bf16 %v783_v28, %v780_v27 }
 0x12f   : > { %v1107_v34 = vpack.c.bf16 %v775_v32, %v772_v31 }
 0x130   : > { %1116 = vst [vmem:[#allocation2 + $0x8] sm:$0xff] %v1108_v33 }
 0x131   : > { %1115 = vst [vmem:[#allocation2] sm:$0xff] %v1107_v34  ;;  %v2559_v37 = vpop.f32.mrb[4].mxu0  ;;  %v2587_v38 = vpop.f32.mrb[4].mxu1 }
 0x132   : > { %v1069_v40 = vadd.f32 %v2587_v38, %v899_v17  ;;  %v787_v41 = vpop.f32.mrb[5].mxu0  ;;  %v1060_v42 = vpop.f32.mrb[5].mxu1  ;;  %v796_v49 = vadd.f32 %v2559_v37, %v589_v1 }
 0x133   : > { %v1061_v46 = vadd.f32 %v1060_v42, %v889_v15  ;;  %v2560_v47 = vpop.f32.mrb[6].mxu0  ;;  %v2588_v48 = vpop.f32.mrb[6].mxu1  ;;  %v788_v55 = vadd.f32 %v787_v41, %v579_v63 }
 0x134   : > { %v2828_v50 = vpack.i.bf16 %v1069_v40, %v1053_v39  ;;  %v799_v51 = vadd.f32 %v2560_v47, %v594_v2  ;;  %v1072_v52 = vadd.f32 %v2588_v48, %v904_v18  ;;  %v790_v53 = vpop.f32.mrb[7].mxu0  ;;  %v1063_v54 = vpop.f32.mrb[7].mxu1 }
 0x135   : > { %v2824_v56 = vpack.i.bf16 %v1061_v46, %v1045_v43  ;;  %v791_v57 = vadd.f32 %v790_v53, %v584_v0  ;;  %v1064_v58 = vadd.f32 %v1063_v54, %v894_v16  ;;  %v924_v25 = vpop.permute.xlu0 %923  ;;  %v944_v26 = vpop.permute.xlu1 %943 }
 0x136   : > { %v1110_v59 = vpack.c.bf16 %v799_v51, %v796_v49  ;;  %v2830_v60 = vpack.i.bf16 %v1072_v52, %v1056_v44 }
 0x137   : > { %v1109_v61 = vpack.c.bf16 %v791_v57, %v788_v55  ;;  %v2826_v62 = vpack.i.bf16 %v1064_v58, %v1048_v45  ;;  %2825 = vxpose.xlu0.b32.start [1/4] (short) %v2824_v56, 128 }
 0x138   : > { %1118 = vst [vmem:[#allocation2 + $0x18] sm:$0xff] %v1110_v59 }
 0x139   : > { %1117 = vst [vmem:[#allocation2 + $0x10] sm:$0xff] %v1109_v61  ;;  %v2563_v13 = vpop.f32.mrb[8].mxu0  ;;  %v2591_v1 = vpop.f32.mrb[8].mxu1 }
 0x13a   : > { %v803_v14 = vpop.f32.mrb[9].mxu0  ;;  %v1076_v2 = vpop.f32.mrb[9].mxu1  ;;  %v812_v63 = vadd.f32 %v2563_v13, %v3494_v5  ;;  %v1085_v29 = vadd.f32 %v2591_v1, %v919_v11 }
 0x13b   : > { %v2592_v15 = vpop.f32.mrb[10].mxu1  ;;  %2827 = vxpose.xlu0.b32.cont [2/4] (short) %v2826_v62, 128  ;;  %v2564_v17 = vpop.f32.mrb[10].mxu0  ;;  %v804_v21 = vadd.f32 %v803_v14, %v3490_v3 }
 0x13c   : > { %v815_v0 = vadd.f32 %v2564_v17, %v3496_v6  ;;  %v806_v16 = vpop.f32.mrb[11].mxu0  ;;  %v1079_v18 = vpop.f32.mrb[11].mxu1  ;;  %v1077_v6 = vadd.f32 %v1076_v2, %v3506_v19  ;;  %v1088_v32 = vadd.f32 %v2592_v15, %v924_v25 }
 0x13d   : > { %v807_v22 = vadd.f32 %v806_v16, %v3492_v4  ;;  %v1080_v3 = vadd.f32 %v1079_v18, %v3508_v20 }
 0x13e   : > { %v1112_v23 = vpack.c.bf16 %v815_v0, %v812_v63 }
 0x13f   : > { %v1111_v24 = vpack.c.bf16 %v807_v22, %v804_v21  ;;  %2829 = vxpose.xlu0.b32.cont [3/4] (short) %v2828_v50, 128 }
 0x140   : > { %1120 = vst [vmem:[#allocation2 + $0x28] sm:$0xff] %v1112_v23 }
 0x141   : > { %1119 = vst [vmem:[#allocation2 + $0x20] sm:$0xff] %v1111_v24  ;;  %v2567_v27 = vpop.f32.mrb[12].mxu0  ;;  %v2595_v28 = vpop.f32.mrb[12].mxu1 }
 0x142   : > { %v1101_v30 = vadd.f32 %v2595_v28, %v939_v12  ;;  %v819_v5 = vpop.f32.mrb[13].mxu0  ;;  %v1092_v31 = vpop.f32.mrb[13].mxu1  ;;  %v828_v37 = vadd.f32 %v2567_v27, %v3502_v9 }
 0x143   : > { %v1093_v4 = vadd.f32 %v1092_v31, %v3510_v35  ;;  %v2596_v33 = vpop.f32.mrb[14].mxu1  ;;  %2831 = vxpose.xlu0.b32.end [4/4] (short) %v2830_v60, 128  ;;  %v2568_v34 = vpop.f32.mrb[14].mxu0  ;;  %v820_v43 = vadd.f32 %v819_v5, %v3498_v7 }
 0x144   : > { %v2916_v38 = vpack.i.bf16 %v1101_v30, %v1085_v29  ;;  %v1104_v39 = vadd.f32 %v2596_v33, %v944_v26  ;;  %v831_v40 = vadd.f32 %v2568_v34, %v3504_v10  ;;  %v822_v41 = vpop.f32.mrb[15].mxu0  ;;  %v1095_v42 = vpop.f32.mrb[15].mxu1 }
 0x145   : > { %v2912_v44 = vpack.i.bf16 %v1093_v4, %v1077_v6  ;;  %v823_v19 = vadd.f32 %v822_v41, %v3500_v8  ;;  %v1096_v20 = vadd.f32 %v1095_v42, %v3512_v36 }
 0x146   : > { %v2918_v45 = vpack.i.bf16 %v1104_v39, %v1088_v32  ;;  %v1114_v35 = vpack.c.bf16 %v831_v40, %v828_v37 }
 0x147   : > { %v1113_v46 = vpack.c.bf16 %v823_v19, %v820_v43  ;;  %v2914_v47 = vpack.i.bf16 %v1096_v20, %v1080_v3  ;;  %2913 = vxpose.xlu1.b32.start [1/4] (short) %v2912_v44, 128 }
 0x148   : > { %1122 = vst [vmem:[#allocation2 + $0x38] sm:$0xff] %v1114_v35 }
 0x149   : > { %1121 = vst [vmem:[#allocation2 + $0x30] sm:$0xff] %v1113_v46 }
 0x14b   : > { %2915 = vxpose.xlu1.b32.cont [2/4] (short) %v2914_v47, 128 }
 0x14f   : > { %2917 = vxpose.xlu1.b32.cont [3/4] (short) %v2916_v38, 128 }
 0x153   : > { %2919 = vxpose.xlu1.b32.end [4/4] (short) %v2918_v45, 128 }
 0x1b7   : > { %v2832_v9 = vpop.trf.xlu0 }
 0x1b8   : > { %v2836_v10 = vunpack.i.h.bf16 %v2832_v9  ;;  %v2833_v48 = vunpack.i.l.bf16 %v2832_v9 }
 0x1bb   : > { %v2837_v49 = vpop.trf.xlu0 }
 0x1bc   : > { %v2841_v7 = vunpack.i.h.bf16 %v2837_v49  ;;  %v2838_v50 = vunpack.i.l.bf16 %v2837_v49 }
 0x1be   : > { %v1251_v8 = vpack.c.bf16 %v2838_v50, %v2833_v48  ;;  %v1259_v51 = vpack.c.bf16 %v2841_v7, %v2836_v10 }
 0x1bf   : > { %v2842_v36 = vpop.trf.xlu0 }
 0x1c0   : > { %1284 = vst.msk [vmem:[#allocation3] sm:$0xff] %vm1283_vm1, %v1251_v8  ;;  %1292 = vst.msk [vmem:[#allocation3 + $0x40] sm:$0xff] %vm1283_vm1, %v1259_v51  ;;  %v2846_v52 = vunpack.i.h.bf16 %v2842_v36  ;;  %v2843_v53 = vunpack.i.l.bf16 %v2842_v36 }
 0x1c3   : > { %v2847_v54 = vpop.trf.xlu0 }
 0x1c4   : > { %v2851_v55 = vunpack.i.h.bf16 %v2847_v54  ;;  %v2848_v56 = vunpack.i.l.bf16 %v2847_v54 }
 0x1c6   : > { %v1252_v57 = vpack.c.bf16 %v2848_v56, %v2843_v53  ;;  %v1260_v58 = vpack.c.bf16 %v2851_v55, %v2846_v52 }
 0x1c7   : > { %v2920_v59 = vpop.trf.xlu1  ;;  %v2852_v60 = vpop.trf.xlu0 }
 0x1c8   : > { %1285 = vst.msk [vmem:[#allocation3 + $0x8] sm:$0xff] %vm1283_vm1, %v1252_v57  ;;  %1293 = vst.msk [vmem:[#allocation3 + $0x48] sm:$0xff] %vm1283_vm1, %v1260_v58  ;;  %v2924_v61 = vunpack.i.h.bf16 %v2920_v59  ;;  %v2921_v62 = vunpack.i.l.bf16 %v2920_v59  ;;  %v2856_v12 = vunpack.i.h.bf16 %v2852_v60  ;;  %v2853_v13 = vunpack.i.l.bf16 %v2852_v60 }
 0x1cb   : > { %v2925_v11 = vpop.trf.xlu1  ;;  %v2857_v1 = vpop.trf.xlu0 }
 0x1cc   : > { %v2929_v14 = vunpack.i.h.bf16 %v2925_v11  ;;  %v2926_v2 = vunpack.i.l.bf16 %v2925_v11  ;;  %v2861_v15 = vunpack.i.h.bf16 %v2857_v1  ;;  %v2858_v17 = vunpack.i.l.bf16 %v2857_v1 }
 0x1ce   : > { %v1267_v63 = vpack.c.bf16 %v2926_v2, %v2921_v62  ;;  %v1275_v0 = vpack.c.bf16 %v2929_v14, %v2924_v61  ;;  %v1253_v18 = vpack.c.bf16 %v2858_v17, %v2853_v13  ;;  %v1261_v21 = vpack.c.bf16 %v2861_v15, %v2856_v12 }
 0x1cf   : > { %v2930_v16 = vpop.trf.xlu1  ;;  %v2862_v22 = vpop.trf.xlu0 }
 0x1d0   : > { %1300 = vst.msk [vmem:[#allocation3 + $0x80] sm:$0xff] %vm1283_vm1, %v1267_v63  ;;  %1308 = vst.msk [vmem:[#allocation3 + $0xc0] sm:$0xff] %vm1283_vm1, %v1275_v0  ;;  %v2934_v23 = vunpack.i.h.bf16 %v2930_v16  ;;  %v2931_v24 = vunpack.i.l.bf16 %v2930_v16  ;;  %v2866_v26 = vunpack.i.h.bf16 %v2862_v22  ;;  %v2863_v27 = vunpack.i.l.bf16 %v2862_v22 }
 0x1d1   : > { %1286 = vst.msk [vmem:[#allocation3 + $0x10] sm:$0xff] %vm1283_vm1, %v1253_v18  ;;  %1294 = vst.msk [vmem:[#allocation3 + $0x50] sm:$0xff] %vm1283_vm1, %v1261_v21 }
 0x1d3   : > { %v2935_v25 = vpop.trf.xlu1  ;;  %v2867_v28 = vpop.trf.xlu0 }
 0x1d4   : > { %v2939_v29 = vunpack.i.h.bf16 %v2935_v25  ;;  %v2936_v30 = vunpack.i.l.bf16 %v2935_v25  ;;  %v2871_v5 = vunpack.i.h.bf16 %v2867_v28  ;;  %v2868_v31 = vunpack.i.l.bf16 %v2867_v28 }
 0x1d6   : > { %v1268_v6 = vpack.c.bf16 %v2936_v30, %v2931_v24  ;;  %v1276_v32 = vpack.c.bf16 %v2939_v29, %v2934_v23  ;;  %v1254_v4 = vpack.c.bf16 %v2868_v31, %v2863_v27  ;;  %v1262_v33 = vpack.c.bf16 %v2871_v5, %v2866_v26 }
 0x1d7   : > { %v2940_v3 = vpop.trf.xlu1  ;;  %v2872_v34 = vpop.trf.xlu0 }
 0x1d8   : > { %1301 = vst.msk [vmem:[#allocation3 + $0x88] sm:$0xff] %vm1283_vm1, %v1268_v6  ;;  %1309 = vst.msk [vmem:[#allocation3 + $0xc8] sm:$0xff] %vm1283_vm1, %v1276_v32  ;;  %v2944_v37 = vunpack.i.h.bf16 %v2940_v3  ;;  %v2941_v38 = vunpack.i.l.bf16 %v2940_v3  ;;  %v2876_v40 = vunpack.i.h.bf16 %v2872_v34  ;;  %v2873_v41 = vunpack.i.l.bf16 %v2872_v34 }
 0x1d9   : > { %1287 = vst.msk [vmem:[#allocation3 + $0x18] sm:$0xff] %vm1283_vm1, %v1254_v4  ;;  %1295 = vst.msk [vmem:[#allocation3 + $0x58] sm:$0xff] %vm1283_vm1, %v1262_v33 }
 0x1db   : > { %v2945_v39 = vpop.trf.xlu1  ;;  %v2877_v42 = vpop.trf.xlu0 }
 0x1dc   : > { %v2949_v43 = vunpack.i.h.bf16 %v2945_v39  ;;  %v2946_v44 = vunpack.i.l.bf16 %v2945_v39  ;;  %v2881_v19 = vunpack.i.h.bf16 %v2877_v42  ;;  %v2878_v20 = vunpack.i.l.bf16 %v2877_v42 }
 0x1de   : > { %v1269_v45 = vpack.c.bf16 %v2946_v44, %v2941_v38  ;;  %v1277_v35 = vpack.c.bf16 %v2949_v43, %v2944_v37  ;;  %v1255_v47 = vpack.c.bf16 %v2878_v20, %v2873_v41  ;;  %v1263_v9 = vpack.c.bf16 %v2881_v19, %v2876_v40 }
 0x1df   : > { %v2950_v46 = vpop.trf.xlu1  ;;  %v2882_v10 = vpop.trf.xlu0 }
 0x1e0   : > { %1302 = vst.msk [vmem:[#allocation3 + $0x90] sm:$0xff] %vm1283_vm1, %v1269_v45  ;;  %1310 = vst.msk [vmem:[#allocation3 + $0xd0] sm:$0xff] %vm1283_vm1, %v1277_v35  ;;  %v2954_v48 = vunpack.i.h.bf16 %v2950_v46  ;;  %v2951_v49 = vunpack.i.l.bf16 %v2950_v46  ;;  %v2886_v50 = vunpack.i.h.bf16 %v2882_v10  ;;  %v2883_v8 = vunpack.i.l.bf16 %v2882_v10 }
 0x1e1   : > { %1288 = vst.msk [vmem:[#allocation3 + $0x20] sm:$0xff] %vm1283_vm1, %v1255_v47  ;;  %1296 = vst.msk [vmem:[#allocation3 + $0x60] sm:$0xff] %vm1283_vm1, %v1263_v9 }
 0x1e3   : > { %v2955_v7 = vpop.trf.xlu1  ;;  %v2887_v51 = vpop.trf.xlu0 }
 0x1e4   : > { %v2959_v36 = vunpack.i.h.bf16 %v2955_v7  ;;  %v2956_v52 = vunpack.i.l.bf16 %v2955_v7  ;;  %v2891_v53 = vunpack.i.h.bf16 %v2887_v51  ;;  %v2888_v54 = vunpack.i.l.bf16 %v2887_v51 }
 0x1e6   : > { %v1270_v55 = vpack.c.bf16 %v2956_v52, %v2951_v49  ;;  %v1278_v56 = vpack.c.bf16 %v2959_v36, %v2954_v48  ;;  %v1256_v58 = vpack.c.bf16 %v2888_v54, %v2883_v8  ;;  %v1264_v59 = vpack.c.bf16 %v2891_v53, %v2886_v50 }
 0x1e7   : > { %v2960_v57 = vpop.trf.xlu1  ;;  %v2892_v60 = vpop.trf.xlu0 }
 0x1e8   : > { %1303 = vst.msk [vmem:[#allocation3 + $0x98] sm:$0xff] %vm1283_vm1, %v1270_v55  ;;  %1311 = vst.msk [vmem:[#allocation3 + $0xd8] sm:$0xff] %vm1283_vm1, %v1278_v56  ;;  %v2964_v61 = vunpack.i.h.bf16 %v2960_v57  ;;  %v2961_v62 = vunpack.i.l.bf16 %v2960_v57  ;;  %v2896_v12 = vunpack.i.h.bf16 %v2892_v60  ;;  %v2893_v13 = vunpack.i.l.bf16 %v2892_v60 }
 0x1e9   : > { %1289 = vst.msk [vmem:[#allocation3 + $0x28] sm:$0xff] %vm1283_vm1, %v1256_v58  ;;  %1297 = vst.msk [vmem:[#allocation3 + $0x68] sm:$0xff] %vm1283_vm1, %v1264_v59 }
 0x1eb   : > { %v2965_v11 = vpop.trf.xlu1  ;;  %v2897_v1 = vpop.trf.xlu0 }
 0x1ec   : > { %v2969_v14 = vunpack.i.h.bf16 %v2965_v11  ;;  %v2966_v2 = vunpack.i.l.bf16 %v2965_v11  ;;  %v2901_v15 = vunpack.i.h.bf16 %v2897_v1  ;;  %v2898_v17 = vunpack.i.l.bf16 %v2897_v1 }
 0x1ee   : > { %v1271_v63 = vpack.c.bf16 %v2966_v2, %v2961_v62  ;;  %v1279_v0 = vpack.c.bf16 %v2969_v14, %v2964_v61  ;;  %v1257_v18 = vpack.c.bf16 %v2898_v17, %v2893_v13  ;;  %v1265_v21 = vpack.c.bf16 %v2901_v15, %v2896_v12 }
 0x1ef   : > { %v2970_v16 = vpop.trf.xlu1  ;;  %v2902_v22 = vpop.trf.xlu0 }
 0x1f0   : > { %1304 = vst.msk [vmem:[#allocation3 + $0xa0] sm:$0xff] %vm1283_vm1, %v1271_v63  ;;  %1312 = vst.msk [vmem:[#allocation3 + $0xe0] sm:$0xff] %vm1283_vm1, %v1279_v0  ;;  %v2974_v23 = vunpack.i.h.bf16 %v2970_v16  ;;  %v2971_v24 = vunpack.i.l.bf16 %v2970_v16  ;;  %v2906_v26 = vunpack.i.h.bf16 %v2902_v22  ;;  %v2903_v27 = vunpack.i.l.bf16 %v2902_v22 }
 0x1f1   : > { %1290 = vst.msk [vmem:[#allocation3 + $0x30] sm:$0xff] %vm1283_vm1, %v1257_v18  ;;  %1298 = vst.msk [vmem:[#allocation3 + $0x70] sm:$0xff] %vm1283_vm1, %v1265_v21 }
 0x1f3   : > { %v2975_v25 = vpop.trf.xlu1  ;;  %v2907_v28 = vpop.trf.xlu0 }
 0x1f4   : > { %v2979_v29 = vunpack.i.h.bf16 %v2975_v25  ;;  %v2976_v30 = vunpack.i.l.bf16 %v2975_v25  ;;  %v2911_v5 = vunpack.i.h.bf16 %v2907_v28  ;;  %v2908_v31 = vunpack.i.l.bf16 %v2907_v28 }
 0x1f6   : > { %v1272_v6 = vpack.c.bf16 %v2976_v30, %v2971_v24  ;;  %v1280_v32 = vpack.c.bf16 %v2979_v29, %v2974_v23  ;;  %v1258_v4 = vpack.c.bf16 %v2908_v31, %v2903_v27  ;;  %v1266_v33 = vpack.c.bf16 %v2911_v5, %v2906_v26 }
 0x1f7   : > { %v2980_v3 = vpop.trf.xlu1 }
 0x1f8   : > { %1305 = vst.msk [vmem:[#allocation3 + $0xa8] sm:$0xff] %vm1283_vm1, %v1272_v6  ;;  %1313 = vst.msk [vmem:[#allocation3 + $0xe8] sm:$0xff] %vm1283_vm1, %v1280_v32  ;;  %v2984_v34 = vunpack.i.h.bf16 %v2980_v3  ;;  %v2981_v37 = vunpack.i.l.bf16 %v2980_v3 }
 0x1f9   : > { %1291 = vst.msk [vmem:[#allocation3 + $0x38] sm:$0xff] %vm1283_vm1, %v1258_v4  ;;  %1299 = vst.msk [vmem:[#allocation3 + $0x78] sm:$0xff] %vm1283_vm1, %v1266_v33 }
 0x1fb   : > { %v2985_v38 = vpop.trf.xlu1 }
 0x1fc   : > { %v2989_v39 = vunpack.i.h.bf16 %v2985_v38  ;;  %v2986_v40 = vunpack.i.l.bf16 %v2985_v38 }
 0x1fe   : > { %v1273_v41 = vpack.c.bf16 %v2986_v40, %v2981_v37  ;;  %v1281_v42 = vpack.c.bf16 %v2989_v39, %v2984_v34 }
 0x1ff   : > { %v2990_v43 = vpop.trf.xlu1 }
 0x200   : > { %1306 = vst.msk [vmem:[#allocation3 + $0xb0] sm:$0xff] %vm1283_vm1, %v1273_v41  ;;  %1314 = vst.msk [vmem:[#allocation3 + $0xf0] sm:$0xff] %vm1283_vm1, %v1281_v42  ;;  %v2994_v44 = vunpack.i.h.bf16 %v2990_v43  ;;  %v2991_v19 = vunpack.i.l.bf16 %v2990_v43 }
 0x203   : > { %v2995_v20 = vpop.trf.xlu1 }
 0x204   : > { %v2999_v45 = vunpack.i.h.bf16 %v2995_v20  ;;  %v2996_v35 = vunpack.i.l.bf16 %v2995_v20 }
 0x206   : > { %v1274_v46 = vpack.c.bf16 %v2996_v35, %v2991_v19  ;;  %v1282_v47 = vpack.c.bf16 %v2999_v45, %v2994_v44 }
 0x208   : > { %1307 = vst.msk [vmem:[#allocation3 + $0xb8] sm:$0xff] %vm1283_vm1, %v1274_v46  ;;  %1315 = vst.msk [vmem:[#allocation3 + $0xf8] sm:$0xff] %vm1283_vm1, %v1282_v47 }
 0x209 PF: > { %v3022_v9 = vld [vmem:[%s3797_s3] sm:$0xff]   ;;  %v3147_v10 = vmov 0.0   ;;  %v3023_v48 = vld [vmem:[%s3797_s3 + $0x8] sm:$0xff]   ;;  %vm3148_vm2 = vmmov 0   ;;  %v3024_v49 = vld [vmem:[%s3797_s3 + $0x10] sm:$0xff]   ;;  %vm1356_vm3 = vcmask 523264   ;;  %v1415_v61 = vlaneseq }
 0x20a   : > { %2597 = vmatprep.subr.bf16.mxu1 %v3147_v10  ;;  %2625 = vmatprep.subr.bf16.mxu0 %v3147_v10  ;;  %v3025_v7 = vld [vmem:[%s3797_s3 + $0x18] sm:$0xff]   ;;  %v1316_v50 = vld [vmem:[%s3317_s27] sm:$0xf]  ;;  %s3149_s17 = smov 32   ;;  %s3150_s27 = smov 96   ;;  %v1551_v57 = vld [vmem:[#allocation2 + $0x8] sm:$0xff] }
 0x20b   : > { %2598 = vmatpush3.bf16.msra.mxu1 %v3022_v9  ;;  %2605 = vmatprep.mubr.msk.bf16.mxu1 %vm3148_vm2, %v3147_v10  ;;  %v2414_v8 = vld [vmem:[%s3798_s4] ss:$0 sm:$0xff]  ;;  %s3151_s28 = smov 64   ;;  %v1555_v58 = vld [vmem:[#allocation2 + $0x28] sm:$0xff]  ;;  %v3152_v59 = vmov 1983009808  }
 0x20c   : > { %2599 = vmatprep.subr.bf16.mxu1 %v3147_v10  ;;  %2629 = vmatprep.mubr.msk.bf16.mxu0 %vm3148_vm2, %v3147_v10  ;;  %v1550_v55 = vld [vmem:[#allocation2] sm:$0xff]  ;;  %v1413_v60 = vunpack.c.l.s4 %v3152_v59  ;;  %v3153_v62 = vmov 1934713408   ;;  %v1416_v13 = vshrl.u32 %v1415_v61, 7  ;;  %vm1566_vm4 = vcmask 261120   ;;  %v1552_v9 = vld [vmem:[#allocation2 + $0x10] sm:$0xff] }
 0x20d   : > { %v1554_v56 = vld [vmem:[#allocation2 + $0x20] sm:$0xff]  ;;  %v1445_v11 = vunpack.c.l.s4 %v3153_v62  ;;  %vm2121_vm5 = vcmask 785408   ;;  %s2438_s25 = sshll.u32 %s3132_s21, 1  ;;  %s2252_s26 = sshll.u32 %s3321_s18, 4  ;;  %s3740_s26 = int_to_ptr.vmem [resolvable:$true] %s2252_s26 }
 0x20e   : > { %2626 = vmatpush3.bf16.msra.mxu0 %v1554_v56  ;;  %v1414_v12 = vunpack.c.0.s8 %v1413_v60  ;;  %s3830_s2 = sld [smem:[#allocation18_spill]]  ;;  %s3050_s21 = scalar_lea.vmem %s3740_s26, 128 }
 0x20f   : > { %2600 = vmatpush3.bf16.msra.mxu1 %v3023_v48  ;;  %2627 = vmatprep.subr.bf16.mxu0 %v3147_v10  ;;  %v1446_v2 = vunpack.c.0.s8 %v1445_v11  ;;  %p3051_p4 = scmp.ne.s32.totalorder %s3740_s26, %s3050_s21  ;;  %s3154_s23 = smov [#allocation5]  }
 0x210   : > { %2601 = vmatprep.subr.bf16.mxu1 %v3147_v10  ;;  %v3594_v15 = vsub.s32 %v1414_v12, %v1416_v13 }
 0x211   : > { %v3596_v21 = vsub.s32 %v1446_v2, %v1416_v13  ;;  %v2450_v13 = vld [vmem:[%s3319_s19 + $0x8] sm:$0xff]   ;;  %p3052_p5 = pnand %p3051_p4, %p3275_p8 }
 0x212   : > { %2628 = vmatpush3.bf16.msra.mxu0 %v1555_v58 }
 0x213   : > { %2602 = vmatpush3.bf16.msra.mxu1 %v3024_v49  ;;  %2641 = vmatprep.subr.bf16.mxu0 %v3147_v10  ;;  %v1553_v49 = vld [vmem:[#allocation2 + $0x18] sm:$0xff]  ;;  %p3053_p6 = pneg %p3052_p5 }
 0x214   : > { %2603 = vmatprep.subr.bf16.mxu1 %v3147_v10 }
 0x217   : > { %2604 = vmatpush3.bf16.msra.mxu1 %v3025_v7 }
 0x218   : > { %2609 = vmatprep.subr.bf16.mxu1 %v3147_v10 }
 0x21a   : > { %2606 = vmatmul.mubr.msk.bf16.vlgmr.msra.gmra.mrb[0].mxu1 %vm1356_vm3, %v1316_v50 }
 0x21b   : > { %2613 = vmatprep.mubr.msk.bf16.mxu1 %vm3148_vm2, %v3147_v10  ;;  %2610 = vmatpush3.bf16.msra.mxu1 %v1550_v55 }
 0x21c   : > { %2611 = vmatprep.subr.bf16.mxu1 %v3147_v10 }
 0x21f   : > { %2612 = vmatpush3.bf16.msra.mxu1 %v1551_v57 }
 0x220   : > { %2617 = vmatprep.subr.bf16.mxu1 %v3147_v10 }
 0x2ed   : > { %v1394_v51 = vpop.f32.mrb[0].mxu1 }
 0x2ee   : > { %v1395_v36 = vadd.f32 %v2414_v8, %v1394_v51  ;;  %v2607_v52 = vpop.f32.mrb[1].mxu1  ;;  %v1556_v8 = vld [vmem:[#allocation2 + $0x30] sm:$0xff] }
 0x2ef   : > { %v1397_v53 = vpop.f32.mrb[2].mxu1 }
 0x2f0   : > { %1407 = vrot.lane.b32.xlu1 %v1395_v36, %s3149_s17  ;;  %1401 = vrot.lane.b32.xlu0 %v1395_v36, %s3150_s27  ;;  %v2608_v54 = vpop.f32.mrb[3].mxu1  ;;  %v2443_v53 = vld [vmem:[%s3319_s19] sm:$0xff]   ;;  %s3054_s19 = sshll.u32 %s3154_s23, 4  ;;  %s3055_s19 = int_to_ptr.vmem [resolvable:$false] %s3054_s19 }
 0x2f1   : > { %v2444_v54 = vunpack.c.l.bf16 %v2443_v53  ;;  %v2445_v12 = vunpack.c.h.bf16 %v2443_v53  ;;  %s3056_s30 = scalar_lea.vmem %s3055_s19, 256  ;;  %p3057_p7 = scmp.lt.s32.totalorder %s3740_s26, %s3055_s19 }
 0x2f2   : > { %p3058_p10 = scmp.lt.s32.totalorder %s3056_s30, %s3050_s21 }
 0x2f4   : > { %1404 = vrot.lane.b32.xlu0 %v1395_v36, %s3151_s28  ;;  %p3059_p11 = por %p3058_p10, %p3057_p7 }
 0x2f6   : > { %p3060_p12 = pnand %p3059_p11, %p3053_p6 }
 0x362   : > { %v1408_v1 = vpop.permute.xlu1 %1407  ;;  %v1402_v14 = vpop.permute.xlu0 %1401 }
 0x363   : > { %v1426_v17 = vcombine.low %v1402_v14, %v1408_v1  ;;  %v1427_v63 = vcombine.high %v1402_v14, %v1408_v1  ;;  %v2448_v14 = vunpack.c.l.bf16 %v2450_v13 }
 0x365   : > { %v1434_v22 = vrot.slane %v1426_v17, %v3594_v15  ;;  %v1441_v23 = vrot.slane %v1427_v63, %v3594_v15 }
 0x366   : > { %v1405_v0 = vpop.permute.xlu0 %1404 }
 0x367   : > { %v1410_v16 = vcombine.low %v1395_v36, %v1405_v0  ;;  %v1411_v18 = vcombine.high %v1395_v36, %v1405_v0  ;;  %v1557_v36 = vld [vmem:[#allocation2 + $0x38] sm:$0xff] }
 0x369   : > { %v1418_v24 = vrot.slane %v1410_v16, %v3594_v15  ;;  %v1425_v25 = vrot.slane %v1411_v18, %v3594_v15  ;;  %v2449_v18 = vunpack.c.h.bf16 %v2450_v13  ;;  %v1799_v13 = vld [vmem:[#allocation3 + $0xa0] sm:$0xff] }
 0x36b   : > { %v1442_v26 = vcombine.low %v1418_v24, %v1434_v22  ;;  %v1443_v27 = vcombine.high %v1418_v24, %v1434_v22  ;;  %v1458_v28 = vcombine.low %v1425_v25, %v1441_v23  ;;  %v1459_v29 = vcombine.high %v1425_v25, %v1441_v23 }
 0x36d   : > { %v1450_v30 = vrot.slane %v1442_v26, %v3596_v21  ;;  %v1457_v5 = vrot.slane %v1443_v27, %v3596_v21  ;;  %v1466_v31 = vrot.slane %v1458_v28, %v3596_v21  ;;  %v1473_v6 = vrot.slane %v1459_v29, %v3596_v21  ;;  %v1779_v27 = vld [vmem:[#allocation3] sm:$0xff]  ;;  %v1780_v29 = vld [vmem:[#allocation3 + $0x8] sm:$0xff] }
 0x36e   : > { %v1787_v28 = vld [vmem:[#allocation3 + $0x40] sm:$0xff] }
 0x36f   : > { %v1478_v32 = vcombine.low %v1450_v30, %v1457_v5  ;;  %v2420_v3 = vcombine.high %v1450_v30, %v1457_v5  ;;  %v1494_v4 = vcombine.low %v1466_v31, %v1473_v6  ;;  %v2421_v33 = vcombine.high %v1466_v31, %v1473_v6  ;;  %v1788_v30 = vld [vmem:[#allocation3 + $0x48] sm:$0xff]  ;;  %v1781_v5 = vld [vmem:[#allocation3 + $0x10] sm:$0xff]  ;;  %v1782_v6 = vld [vmem:[#allocation3 + $0x18] sm:$0xff] }
 0x370   : > { %v1789_v31 = vld [vmem:[#allocation3 + $0x50] sm:$0xff] }
 0x371   : > { %v1485_v34 = vrot.slane %v1478_v32, %v3594_v15  ;;  %v1493_v37 = vrot.slane %v2420_v3, %v3594_v15  ;;  %v1501_v38 = vrot.slane %v1494_v4, %v3594_v15  ;;  %v1509_v39 = vrot.slane %v2421_v33, %v3594_v15  ;;  %v1783_v32 = vld [vmem:[#allocation3 + $0x20] sm:$0xff] }
 0x373   : > { %v1510_v40 = vcombine.low %v1485_v34, %v1493_v37  ;;  %v1526_v41 = vcombine.low %v1501_v38, %v1509_v39  ;;  %v1511_v42 = vcombine.high %v1485_v34, %v1493_v37  ;;  %v1527_v43 = vcombine.high %v1501_v38, %v1509_v39 }
 0x375   : > { %v1518_v44 = vrot.slane %v1510_v40, %v3596_v21  ;;  %v1534_v19 = vrot.slane %v1526_v41, %v3596_v21  ;;  %v1525_v20 = vrot.slane %v1511_v42, %v3596_v21  ;;  %v1541_v45 = vrot.slane %v1527_v43, %v3596_v21 }
 0x377   : > { %v1542_v35 = vcombine.low %v1518_v44, %v1534_v19  ;;  %v1544_v46 = vcombine.low %v1525_v20, %v1541_v45  ;;  %v1543_v7 = vcombine.high %v1518_v44, %v1534_v19  ;;  %v1545_v51 = vcombine.high %v1525_v20, %v1541_v45 }
 0x379   : > { %v1546_v47 = vpack.c.bf16 %v1542_v35, %v1542_v35  ;;  %v1548_v48 = vpack.c.bf16 %v1544_v46, %v1544_v46  ;;  %v1547_v50 = vpack.c.bf16 %v1543_v7, %v1543_v7  ;;  %v1549_v52 = vpack.c.bf16 %v1545_v51, %v1545_v51  ;;  %v1784_v35 = vld [vmem:[#allocation3 + $0x28] sm:$0xff]  ;;  %v1790_v46 = vld [vmem:[#allocation3 + $0x58] sm:$0xff] }
 0x37a   : > { %v1792_v7 = vld [vmem:[#allocation3 + $0x68] sm:$0xff] }
 0x37b   : > { %2614 = vmatmul.mubr.msk.bf16.vlgmr.msra.gmra.mrb[4].mxu1 %vm1566_vm4, %v1546_v47  ;;  %2630 = vmatmul.mubr.msk.bf16.vlgmr.msra.gmra.mrb[0].mxu0 %vm1566_vm4, %v1548_v48  ;;  %v1791_v48 = vld [vmem:[#allocation3 + $0x60] sm:$0xff] }
 0x37c   : > { %2618 = vmatpush3.bf16.msra.mxu1 %v1552_v9  ;;  %2621 = vmatprep.mubr.msk.bf16.mxu1 %vm3148_vm2, %v3147_v10  ;;  %v1785_v9 = vld [vmem:[#allocation3 + $0x30] sm:$0xff] }
 0x37d   : > { %2619 = vmatprep.subr.bf16.mxu1 %v3147_v10  ;;  %2657 = vmatprep.mubr.msk.bf16.mxu0 %vm3148_vm2, %v3147_v10 }
 0x37e   : > { %2642 = vmatpush3.bf16.msra.mxu0 %v1779_v27  ;;  %v1810_v27 = vld [vmem:[#allocation3 + $0xf8] sm:$0xff] }
 0x37f   : > { %2643 = vmatprep.subr.bf16.mxu0 %v3147_v10 }
 0x380   : > { %2620 = vmatpush3.bf16.msra.mxu1 %v1553_v49  ;;  %v1786_v49 = vld [vmem:[#allocation3 + $0x38] sm:$0xff] }
 0x381   : > { %2633 = vmatprep.subr.bf16.mxu1 %v3147_v10 }
 0x382   : > { %2644 = vmatpush3.bf16.msra.mxu0 %v1780_v29 }
 0x383   : > { %2622 = vmatmul.mubr.msk.bf16.vlgmr.msra.gmra.mrb[8].mxu1 %vm1566_vm4, %v1547_v50  ;;  %2645 = vmatprep.subr.bf16.mxu0 %v3147_v10  ;;  %v1793_v50 = vld [vmem:[#allocation3 + $0x70] sm:$0xff] }
 0x384   : > { %2634 = vmatpush3.bf16.msra.mxu1 %v1556_v8  ;;  %2637 = vmatprep.mubr.msk.bf16.mxu1 %vm3148_vm2, %v3147_v10  ;;  %v1794_v8 = vld [vmem:[#allocation3 + $0x78] sm:$0xff] }
 0x385   : > { %2635 = vmatprep.subr.bf16.mxu1 %v3147_v10 }
 0x386   : > { %2646 = vmatpush3.bf16.msra.mxu0 %v1781_v5  ;;  %v3027_v5 = vld [vmem:[%s3803_s9 + $0x8] sm:$0xff]  }
 0x387   : > { %2647 = vmatprep.subr.bf16.mxu0 %v3147_v10 }
 0x388   : > { %2636 = vmatpush3.bf16.msra.mxu1 %v1557_v36 }
 0x389   : > { %2661 = vmatprep.subr.bf16.mxu1 %v3147_v10 }
 0x38a   : > { %2648 = vmatpush3.bf16.msra.mxu0 %v1782_v6  ;;  %v3029_v6 = vld [vmem:[%s3803_s9 + $0x18] sm:$0xff]  }
 0x38b   : > { %2638 = vmatmul.mubr.msk.bf16.vlgmr.msra.gmra.mrb[12].mxu1 %vm1566_vm4, %v1549_v52  ;;  %2649 = vmatprep.subr.bf16.mxu0 %v3147_v10 }
 0x38c   : > { %2677 = vmatprep.mubr.msk.bf16.mxu1 %vm3148_vm2, %v3147_v10  ;;  %2662 = vmatpush3.bf16.msra.mxu1 %v1787_v28 }
 0x38d   : > { %2663 = vmatprep.subr.bf16.mxu1 %v3147_v10 }
 0x38e   : > { %2650 = vmatpush3.bf16.msra.mxu0 %v1783_v32  ;;  %v3030_v32 = vld [vmem:[%s3803_s9 + $0x20] sm:$0xff]  }
 0x38f   : > { %2651 = vmatprep.subr.bf16.mxu0 %v3147_v10 }
 0x390   : > { %2664 = vmatpush3.bf16.msra.mxu1 %v1788_v30  ;;  %v3026_v30 = vld [vmem:[%s3803_s9] sm:$0xff]  }
 0x391   : > { %2665 = vmatprep.subr.bf16.mxu1 %v3147_v10 }
 0x392   : > { %2652 = vmatpush3.bf16.msra.mxu0 %v1784_v35 }
 0x393   : > { %2653 = vmatprep.subr.bf16.mxu0 %v3147_v10 }
 0x394   : > { %2666 = vmatpush3.bf16.msra.mxu1 %v1789_v31  ;;  %v3028_v31 = vld [vmem:[%s3803_s9 + $0x10] sm:$0xff]  }
 0x395   : > { %2667 = vmatprep.subr.bf16.mxu1 %v3147_v10 }
 0x396   : > { %2654 = vmatpush3.bf16.msra.mxu0 %v1785_v9 }
 0x397   : > { %2655 = vmatprep.subr.bf16.mxu0 %v3147_v10 }
 0x398   : > { %2668 = vmatpush3.bf16.msra.mxu1 %v1790_v46 }
 0x399   : > { %2669 = vmatprep.subr.bf16.mxu1 %v3147_v10 }
 0x39a   : > { %2656 = vmatpush3.bf16.msra.mxu0 %v1786_v49 }
 0x39b   : > { %2681 = vmatprep.subr.bf16.mxu0 %v3147_v10 }
 0x39c   : > { %2670 = vmatpush3.bf16.msra.mxu1 %v1791_v48 }
 0x39d   : > { %2671 = vmatprep.subr.bf16.mxu1 %v3147_v10 }
 0x3a0   : > { %2672 = vmatpush3.bf16.msra.mxu1 %v1792_v7 }
 0x3a1   : > { %2673 = vmatprep.subr.bf16.mxu1 %v3147_v10 }
 0x3a4   : > { %2674 = vmatpush3.bf16.msra.mxu1 %v1793_v50 }
 0x3a5   : > { %2675 = vmatprep.subr.bf16.mxu1 %v3147_v10 }
 0x3a8   : > { %2676 = vmatpush3.bf16.msra.mxu1 %v1794_v8 }
 0x3a9   : > { %2701 = vmatprep.subr.bf16.mxu1 %v3147_v10 }
 0x44e   : > { %v1604_v55 = vpop.f32.mrb[4].mxu1  ;;  %v1690_v56 = vpop.f32.mrb[0].mxu0 }
 0x44f   : > { %v1605_v57 = vadd.f32 %v2444_v54, %v1604_v55  ;;  %v2615_v58 = vpop.f32.mrb[5].mxu1  ;;  %v2631_v59 = vpop.f32.mrb[1].mxu0  ;;  %v1691_v16 = vadd.f32 %v2448_v14, %v1690_v56  ;;  %v1795_v55 = vld [vmem:[#allocation3 + $0x80] sm:$0xff]  ;;  %v1796_v56 = vld [vmem:[#allocation3 + $0x88] sm:$0xff] }
 0x450   : > { %v1607_v60 = vpop.f32.mrb[6].mxu1  ;;  %v1693_v61 = vpop.f32.mrb[2].mxu0 }
 0x451   : > { %v2632_v62 = vpop.f32.mrb[3].mxu0  ;;  %1739 = vmax.xlane.f32.xlu1 %v1605_v57  ;;  %v2616_v11 = vpop.f32.mrb[7].mxu1  ;;  %v1797_v60 = vld [vmem:[#allocation3 + $0x90] sm:$0xff]  ;;  %v1803_v61 = vld [vmem:[#allocation3 + $0xc0] sm:$0xff] }
 0x452   : > { %v1798_v11 = vld [vmem:[#allocation3 + $0x98] sm:$0xff] }
 0x456   : > { %v1647_v1 = vpop.f32.mrb[8].mxu1 }
 0x457   : > { %v1648_v2 = vadd.f32 %v2445_v12, %v1647_v1  ;;  %v2623_v17 = vpop.f32.mrb[9].mxu1  ;;  %v1804_v12 = vld [vmem:[#allocation3 + $0xc8] sm:$0xff]  ;;  %v1805_v1 = vld [vmem:[#allocation3 + $0xd0] sm:$0xff] }
 0x458   : > { %v1650_v63 = vpop.f32.mrb[10].mxu1  ;;  %v1806_v17 = vld [vmem:[#allocation3 + $0xd8] sm:$0xff] }
 0x459   : > { %1741 = vmax.xlane.f32.xlu0 %v1648_v2  ;;  %v2624_v0 = vpop.f32.mrb[11].mxu1  ;;  %v1801_v63 = vld [vmem:[#allocation3 + $0xb0] sm:$0xff] }
 0x45a   : > { %v1807_v0 = vld [vmem:[#allocation3 + $0xe0] sm:$0xff] }
 0x45d   : > { %1743 = vmax.xlane.f32.xlu0 %v1691_v16 }
 0x45e   : > { %v1733_v22 = vpop.f32.mrb[12].mxu1 }
 0x45f   : > { %v1734_v23 = vadd.f32 %v2449_v18, %v1733_v22  ;;  %v2639_v24 = vpop.f32.mrb[13].mxu1  ;;  %v1802_v18 = vld [vmem:[#allocation3 + $0xb8] sm:$0xff]  ;;  %v1808_v22 = vld [vmem:[#allocation3 + $0xe8] sm:$0xff] }
 0x460   : > { %v1736_v25 = vpop.f32.mrb[14].mxu1 }
 0x461   : > { %1745 = vmax.xlane.f32.xlu1 %v1734_v23  ;;  %v2640_v26 = vpop.f32.mrb[15].mxu1  ;;  %v1809_v25 = vld [vmem:[#allocation3 + $0xf0] sm:$0xff] }
 0x4de   : > { %v1740_v3 = vpop.xlane.xlu1 %1739 }
 0x4df   : > { %v1747_v4 = vsub.f32 %v1605_v57, %v1740_v3  ;;  %v3031_v3 = vld [vmem:[%s3803_s9 + $0x28] sm:$0xff]  }
 0x4e1   : > { %v1751_v33 = vmul.f32 1.442695, %v1747_v4 }
 0x4e3   : > { %3034 = vpow2.f32 %v1751_v33 }
 0x4e6   : > { %v1742_v34 = vpop.xlane.xlu0 %1741 }
 0x4e7   : > { %v1748_v37 = vsub.f32 %v1648_v2, %v1742_v34  ;;  %v1800_v2 = vld [vmem:[#allocation3 + $0xa8] sm:$0xff] }
 0x4e9   : > { %v1753_v38 = vmul.f32 1.442695, %v1748_v37 }
 0x4ea   : > { %v1744_v39 = vpop.xlane.xlu0 %1743 }
 0x4eb   : > { %3036 = vpow2.f32 %v1753_v38  ;;  %v1749_v40 = vsub.f32 %v1691_v16, %v1744_v39 }
 0x4ed   : > { %v3035_v41 = vpop.eup %3034  ;;  %v1755_v42 = vmul.f32 1.442695, %v1749_v40 }
 0x4ee   : > { %1759 = vadd.xlane.f32.xlu0 %v3035_v41  ;;  %v1746_v43 = vpop.xlane.xlu1 %1745 }
 0x4ef   : > { %3038 = vpow2.f32 %v1755_v42  ;;  %v1750_v44 = vsub.f32 %v1734_v23, %v1746_v43 }
 0x4f1   : > { %v1757_v19 = vmul.f32 1.442695, %v1750_v44 }
 0x4f3   : > { %3040 = vpow2.f32 %v1757_v19 }
 0x4f5   : > { %v3037_v20 = vpop.eup %3036 }
 0x4f6   : > { %1761 = vadd.xlane.f32.xlu1 %v3037_v20 }
 0x4f9   : > { %v3640_v45 = vpop.eup %3038 }
 0x4fa   : > { %1763 = vadd.xlane.f32.xlu0 %v3640_v45 }
 0x4fd   : > { %v3643_v47 = vpop.eup %3040 }
 0x4fe   : > { %1765 = vadd.xlane.f32.xlu1 %v3643_v47 }
 0x57b   : > { %v1760_v51 = vpop.xlane.xlu0 %1759 }
 0x57c   : > { %3042 = vrcp.f32 %v1760_v51 }
 0x583   : > { %v1762_v36 = vpop.xlane.xlu1 %1761 }
 0x584   : > { %3044 = vrcp.f32 %v1762_v36  ;;  %v3032_v36 = vld [vmem:[%s3803_s9 + $0x30] sm:$0xff]  }
 0x586   : > { %v3043_v52 = vpop.eup %3042 }
 0x587   : > { %v1771_v53 = vmul.f32 %v3043_v52, %v3035_v41  ;;  %v1764_v62 = vpop.xlane.xlu0 %1763 }
 0x588   : > { %3046 = vrcp.f32 %v1764_v62 }
 0x589   : > { %v1775_v54 = vpack.c.bf16 %v1771_v53, %v1771_v53 }
 0x58b   : > { %2658 = vmatmul.mubr.bf16.vlgmr.msra.gmra.mrb[4].mxu0 %v1775_v54  ;;  %v1766_v14 = vpop.xlane.xlu1 %1765 }
 0x58c   : > { %2682 = vmatpush3.bf16.msra.mxu0 %v1795_v55  ;;  %2697 = vmatprep.mubr.msk.bf16.mxu0 %vm3148_vm2, %v3147_v10  ;;  %3048 = vrcp.f32 %v1766_v14 }
 0x58d   : > { %2683 = vmatprep.subr.bf16.mxu0 %v3147_v10 }
 0x58e   : > { %v3045_v57 = vpop.eup %3044 }
 0x58f   : > { %v1772_v58 = vmul.f32 %v3045_v57, %v3037_v20 }
 0x590   : > { %2684 = vmatpush3.bf16.msra.mxu0 %v1796_v56 }
 0x591   : > { %2685 = vmatprep.subr.bf16.mxu0 %v3147_v10  ;;  %v1776_v59 = vpack.c.bf16 %v1772_v58, %v1772_v58 }
 0x592   : > { %v3047_v16 = vpop.eup %3046 }
 0x593   : > { %2678 = vmatmul.mubr.bf16.vlgmr.msra.gmra.mrb[16].mxu1 %v1776_v59  ;;  %v1773_v23 = vmul.f32 %v3047_v16, %v3640_v45 }
 0x594   : > { %2686 = vmatpush3.bf16.msra.mxu0 %v1797_v60  ;;  %2702 = vmatpush3.bf16.msra.mxu1 %v1803_v61  ;;  %v3033_v60 = vld [vmem:[%s3803_s9 + $0x38] sm:$0xff]  }
 0x595   : > { %2687 = vmatprep.subr.bf16.mxu0 %v3147_v10  ;;  %2703 = vmatprep.subr.bf16.mxu1 %v3147_v10  ;;  %v1777_v24 = vpack.c.bf16 %v1773_v23, %v1773_v23 }
 0x596   : > { %2717 = vmatprep.mubr.msk.bf16.mxu1 %vm3148_vm2, %v3147_v10  ;;  %v3049_v26 = vpop.eup %3048 }
 0x597   : > { %v1774_v28 = vmul.f32 %v3049_v26, %v3643_v47 }
 0x598   : > { %2688 = vmatpush3.bf16.msra.mxu0 %v1798_v11  ;;  %2704 = vmatpush3.bf16.msra.mxu1 %v1804_v12 }
 0x599   : > { %2689 = vmatprep.subr.bf16.mxu0 %v3147_v10  ;;  %2705 = vmatprep.subr.bf16.mxu1 %v3147_v10  ;;  %v1778_v29 = vpack.c.bf16 %v1774_v28, %v1774_v28 }
 0x59c   : > { %2690 = vmatpush3.bf16.msra.mxu0 %v1799_v13  ;;  %2706 = vmatpush3.bf16.msra.mxu1 %v1805_v1 }
 0x59d   : > { %2691 = vmatprep.subr.bf16.mxu0 %v3147_v10  ;;  %2707 = vmatprep.subr.bf16.mxu1 %v3147_v10 }
 0x5a0   : > { %2692 = vmatpush3.bf16.msra.mxu0 %v1800_v2  ;;  %2708 = vmatpush3.bf16.msra.mxu1 %v1806_v17 }
 0x5a1   : > { %2693 = vmatprep.subr.bf16.mxu0 %v3147_v10  ;;  %2709 = vmatprep.subr.bf16.mxu1 %v3147_v10 }
 0x5a4   : > { %2694 = vmatpush3.bf16.msra.mxu0 %v1801_v63  ;;  %2710 = vmatpush3.bf16.msra.mxu1 %v1807_v0 }
 0x5a5   : > { %2695 = vmatprep.subr.bf16.mxu0 %v3147_v10  ;;  %2711 = vmatprep.subr.bf16.mxu1 %v3147_v10 }
 0x5a8   : > { %2696 = vmatpush3.bf16.msra.mxu0 %v1802_v18  ;;  %2712 = vmatpush3.bf16.msra.mxu1 %v1808_v22 }
 0x5a9   : > { %2713 = vmatprep.subr.bf16.mxu1 %v3147_v10  ;;  %2721 = vmatprep.subr.bf16.mxu0 %v3147_v10 }
 0x5ab   : > { %2698 = vmatmul.mubr.bf16.vlgmr.msra.gmra.mrb[8].mxu0 %v1777_v24 }
 0x5ac   : > { %2714 = vmatpush3.bf16.msra.mxu1 %v1809_v25  ;;  %2737 = vmatprep.mubr.msk.bf16.mxu0 %vm3148_vm2, %v3147_v10 }
 0x5ad   : > { %2715 = vmatprep.subr.bf16.mxu1 %v3147_v10  ;;  %2722 = vmatpush3.bf16.msra.mxu0 %v3026_v30 }
 0x5ae   : > { %2723 = vmatprep.subr.bf16.mxu0 %v3147_v10 }
 0x5b0   : > { %2716 = vmatpush3.bf16.msra.mxu1 %v1810_v27 }
 0x5b1   : > { %2724 = vmatpush3.bf16.msra.mxu0 %v3027_v5 }
 0x5b2   : > { %2725 = vmatprep.subr.bf16.mxu0 %v3147_v10 }
 0x5b3   : > { %2718 = vmatmul.mubr.bf16.vlgmr.msra.gmra.mrb[20].mxu1 %v1778_v29 }
 0x5b5   : > { %2726 = vmatpush3.bf16.msra.mxu0 %v3028_v31 }
 0x5b6   : > { %2727 = vmatprep.subr.bf16.mxu0 %v3147_v10 }
 0x5b9   : > { %2728 = vmatpush3.bf16.msra.mxu0 %v3029_v6  ;;  %v2428_v6 = vld [vmem:[%s3804_s10] ss:$0 sm:$0xff] }
 0x5ba   : > { %2729 = vmatprep.subr.bf16.mxu0 %v3147_v10 }
 0x5bd   : > { %2730 = vmatpush3.bf16.msra.mxu0 %v3030_v32 }
 0x5be   : > { %2731 = vmatprep.subr.bf16.mxu0 %v3147_v10 }
 0x5c1   : > { %2732 = vmatpush3.bf16.msra.mxu0 %v3031_v3 }
 0x5c2   : > { %2733 = vmatprep.subr.bf16.mxu0 %v3147_v10 }
 0x5c5   : > { %2734 = vmatpush3.bf16.msra.mxu0 %v3032_v36 }
 0x5c6   : > { %2735 = vmatprep.subr.bf16.mxu0 %v3147_v10 }
 0x5c9   : > { %2736 = vmatpush3.bf16.msra.mxu0 %v3033_v60 }
 0x65e   : > { %v1845_v4 = vpop.f32.mrb[4].mxu0 }
 0x65f   : > { %v2659_v33 = vpop.f32.mrb[5].mxu0 }
 0x660   : > { %v1848_v34 = vpop.f32.mrb[6].mxu0 }
 0x661   : > { %v2660_v37 = vpop.f32.mrb[7].mxu0 }
 0x666   : > { %v1885_v38 = vpop.f32.mrb[16].mxu1 }
 0x667   : > { %v2679_v39 = vpop.f32.mrb[17].mxu1 }
 0x668   : > { %v1888_v40 = vpop.f32.mrb[18].mxu1 }
 0x669   : > { %v2680_v41 = vpop.f32.mrb[19].mxu1 }
 0x67e   : > { %v1925_v42 = vpop.f32.mrb[8].mxu0 }
 0x67f   : > { %v1971_v43 = vcombine.low %v1845_v4, %v1925_v42  ;;  %v1972_v44 = vcombine.high %v1845_v4, %v1925_v42  ;;  %v2699_v19 = vpop.f32.mrb[9].mxu0 }
 0x680   : > { %v1928_v20 = vpop.f32.mrb[10].mxu0 }
 0x681   : > { %v2700_v45 = vpop.f32.mrb[11].mxu0  ;;  %v1979_v49 = vrot.slane %v1971_v43, %v3594_v15  ;;  %v1986_v7 = vrot.slane %v1972_v44, %v3594_v15 }
 0x686   : > { %v1965_v35 = vpop.f32.mrb[20].mxu1 }
 0x687   : > { %v1987_v46 = vcombine.low %v1885_v38, %v1965_v35  ;;  %v1988_v47 = vcombine.high %v1885_v38, %v1965_v35  ;;  %v2719_v9 = vpop.f32.mrb[21].mxu1 }
 0x688   : > { %v1968_v48 = vpop.f32.mrb[22].mxu1 }
 0x689   : > { %v1995_v50 = vrot.slane %v1987_v46, %v3594_v15  ;;  %v2002_v8 = vrot.slane %v1988_v47, %v3594_v15  ;;  %v2720_v51 = vpop.f32.mrb[23].mxu1 }
 0x68b   : > { %v2003_v52 = vcombine.low %v1979_v49, %v1995_v50  ;;  %v2004_v53 = vcombine.high %v1979_v49, %v1995_v50  ;;  %v2019_v54 = vcombine.low %v1986_v7, %v2002_v8  ;;  %v2020_v55 = vcombine.high %v1986_v7, %v2002_v8 }
 0x68d   : > { %v2011_v56 = vrot.slane %v2003_v52, %v3596_v21  ;;  %v2018_v57 = vrot.slane %v2004_v53, %v3596_v21  ;;  %v2027_v58 = vrot.slane %v2019_v54, %v3596_v21  ;;  %v2034_v59 = vrot.slane %v2020_v55, %v3596_v21 }
 0x68f   : > { %v2039_v61 = vcombine.low %v2011_v56, %v2018_v57  ;;  %v2426_v62 = vcombine.high %v2011_v56, %v2018_v57  ;;  %v2055_v11 = vcombine.low %v2027_v58, %v2034_v59  ;;  %v2427_v12 = vcombine.high %v2027_v58, %v2034_v59 }
 0x691   : > { %v2046_v13 = vrot.slane %v2039_v61, %v3594_v15  ;;  %v2054_v1 = vrot.slane %v2426_v62, %v3594_v15  ;;  %v2062_v14 = vrot.slane %v2055_v11, %v3594_v15  ;;  %v2070_v2 = vrot.slane %v2427_v12, %v3594_v15 }
 0x693   : > { %v2072_v17 = vcombine.high %v2046_v13, %v2054_v1  ;;  %v2088_v63 = vcombine.high %v2062_v14, %v2070_v2  ;;  %v2071_v10 = vcombine.low %v2046_v13, %v2054_v1  ;;  %v2087_v0 = vcombine.low %v2062_v14, %v2070_v2 }
 0x695   : > { %v2086_v16 = vrot.slane %v2072_v17, %v3596_v21  ;;  %v2102_v18 = vrot.slane %v2088_v63, %v3596_v21  ;;  %v2079_v22 = vrot.slane %v2071_v10, %v3596_v21  ;;  %v2095_v23 = vrot.slane %v2087_v0, %v3596_v21 }
 0x697   : > { %v2105_v24 = vcombine.low %v2086_v16, %v2102_v18  ;;  %v2104_v25 = vcombine.high %v2079_v22, %v2095_v23  ;;  %v2106_v26 = vcombine.high %v2086_v16, %v2102_v18  ;;  %v2103_v27 = vcombine.low %v2079_v22, %v2095_v23 }
 0x699   : > { %2112 = vrot.lane.b32.xlu1 %v2105_v24, %s3151_s28  ;;  %2108 = vrot.lane.b32.xlu0 %v2104_v25, %s3149_s17  ;;  %s2248_s28 = sadd.s32 %s3128_s20, %s2438_s25  ;;  %s2237_s20 = scalar_lea.sflag [#allocation6], %s3301_s11 }
 0x69d   : > { %2116 = vrot.lane.b32.xlu1 %v2106_v26, %s3150_s27  ;;  %s2439_s27 = sshll.u32 %s2248_s28, 7 }
 0x69e   : > { %s3738_s22 = scalar_lea.hbm %s3830_s2, %s2439_s27 }
 0x70b   : > { %v2113_v15 = vpop.permute.xlu1 %2112  ;;  %v2109_v28 = vpop.permute.xlu0 %2108 }
 0x70c   : > { %v2119_v29 = vsel %vm1566_vm4, %v2103_v27, %v2109_v28 }
 0x70d   : > { %v2120_v21 = vsel %vm1356_vm3, %v2119_v29, %v2113_v15 }
 0x70f   : > { %v2117_v30 = vpop.permute.xlu1 %2116 }
 0x710   : > { %v2122_v5 = vsel %vm2121_vm5, %v2120_v21, %v2117_v30 }
 0x711   : > { %v2123_v31 = vpack.c.bf16 %v2122_v5, %v2122_v5 }
 0x713   : > { %2738 = vmatmul.mubr.bf16.vlgmr.msra.gmra.mrb[12].mxu0 %v2123_v31 }
 0x7e6   : > { %v2229_v32 = vpop.f32.mrb[12].mxu0 }
 0x7e7   : > { %v2230_v3 = vadd.f32 %v2428_v6, %v2229_v32  ;;  %v2739_v4 = vpop.f32.mrb[13].mxu0 }
 0x7e8   : > { %v2232_v33 = vpop.f32.mrb[14].mxu0 }
 0x7e9   : > { %2235 = vst.msk [vmem:[%s3321_s18] sm:$0xff] %vm1356_vm3, %v2230_v3  ;;  %v2740_v34 = vpop.f32.mrb[15].mxu0 }
 0x7ea   : > { %3063 = shalt.err (!%p3060_p12)
}
 0x7eb   : > { %s3064_s18 = scalar_lea.hbm %s3738_s22, 128  ;;  %s3068_s16 = scalar_lea.hbm %s3830_s2, 512 }
 0x7ec   : > { %p3065_p13 = scmp.ne.s32.totalorder %s3738_s22, %s3064_s18  ;;  %p3069_p2 = scmp.lt.u32.totalorder %s3738_s22, %s3830_s2 }
 0x7ed   : > { %p3070_p3 = scmp.lt.u32.totalorder %s3068_s16, %s3064_s18  ;;  %p3072_p5 = scmp.lt.u32.totalorder %s3064_s18, %s3738_s22 }
 0x7ee   : > { %p3066_p0 = pnand %p3065_p13, %p3275_p8 }
 0x7ef   : > { %p3071_p4 = por %p3070_p3, %p3069_p2 }
 0x7f0   : > { %p3067_p1 = pneg %p3066_p0 }
 0x7f1   : > { %p3073_p6 = por %p3072_p5, %p3071_p4 }
 0x7f3   : > { %p3074_p7 = pnand %p3073_p6, %p3067_p1 }
 0x7f5   : > { %3077 = shalt.err (!%p3074_p7)
}
 0x7f6   : > { %2742 = dma.vmem_to_hbm [thread:$0]  (%p3275_p8), %s3740_s26, 128, %s3738_s22, %s2237_s20  }
 0x7f7 PF: > { %s3831_s14 = sld [smem:[#allocation8_spill]]  ;;  %p2748_p10 = scmp.ge.s32.totalorder %s3144_s24, 2 }
 0x7f9   : > { %p2745_p11 = pnand %p2748_p10, %p3279_p9 }
 0x7fd   : > { %s2264_s27 = sand.u32 1, %s3831_s14  }
 0x7fe   : > { %s2265_s29 = scalar_lea.sflag [#allocation6], %s2264_s27 }
 0x7ff   : > { %3111 = dma.done.wait (!%p2745_p11), %s2265_s29, 128  }
 0x800   : > { %3113 = vsyncadd (!%p2745_p11), %s2265_s29, 4294967168  ;;  %s24_s24 = sadd.s32 1, %s3144_s24   ;;  %s3833_s17 = sld [smem:[#allocation9_spill]] }
 0x801   : > { %p21_p12 = scmp.ge.s32.totalorder %s24_s24, 6   ;;  %s3834_s18 = sld [smem:[#allocation10_spill]] }
 0x802   : > { %s3835_s19 = sld [smem:[#allocation16_spill]]  ;;  %s3836_s20 = sld [smem:[#allocation11_spill]] }
 0x803   : > { %s3837_s21 = sld [smem:[#allocation12_spill]]  ;;  %s3838_s22 = sld [smem:[#allocation13_spill]] }
 0x804   : > { %s3839_s23 = sld [smem:[#allocation14_spill]]  ;;  %23 = sbr.rel (!%p21_p12) target bundleno = 8 (0x8), region = 155 }
 0x80b   :  { %2270 = vsyncpa [#allocation6], 1 }
 0x80c   :  { %2272 = vsyncpa [#allocation6 + $0x1], 1 }

</bundles_post_ra>
